<compile_context>
chip_gen: v5e
topology: v5e:2x2
jax: 0.10.0
libtpu: 0.0.40
codegen_flags: <defaults>
</compile_context>

<pallas_src>
import functools

import jax
import jax.numpy as jnp
from jax.experimental import pallas as pl
from jax.experimental.pallas import tpu as pltpu


def highway_kernel(x_ref, w_ref, b_ref, o_ref, *, activation, d):
    x = x_ref[...]                                        # [Bt, D]  (bf16)
    # One fused MXU matmul: [Bt, D] @ [D, 2D] -> [Bt, 2D], f32 accumulate.
    pre = jnp.dot(x, w_ref[...], preferred_element_type=jnp.float32)
    pre = pre + b_ref[...]                                # [1, 2D] f32 bias
    act = activation(pre[:, :d])                          # f(x @ Wa^T + ba)
    gate = jax.nn.sigmoid(pre[:, d:])                     # sigmoid(x @ Wg^T + bg)
    out = act + (1.0 - gate) * x.astype(jnp.float32)      # exact PyTorch forward
    o_ref[...] = out.astype(o_ref.dtype)


def _round_up(a, b):
    return (a + b - 1) // b * b


def _choose_row_tile(batch, block_b):
    bt = min(block_b, _round_up(batch, 8))
    bt = max(8, (bt // 8) * 8)                 # sublane-aligned
    # Keep >= 4 grid steps (2 per TensorCore on v7x) when the batch allows it,
    # but never shrink below 256 rows (per-step overhead starts to dominate).
    while bt >= 512 and pl.cdiv(batch, bt) < 4:
        bt //= 2
    return bt


def highway(x, act_w, act_b, gate_w, gate_b, *, activation=jax.nn.relu,
            block_b=512, io_dtype=jnp.bfloat16):
    """Highway forward.

    x: [B, D]; act_w / gate_w: [D, D] in PyTorch [out, in] layout;
    act_b / gate_b: [D].  Returns [B, D] in `io_dtype` (bf16 by default).
    """
    B, D = x.shape

    # Pack both linears into one pre-transposed [D, 2D] weight + [1, 2D] bias:
    # columns [0:D] -> activation affine, [D:2D] -> gate affine.
    w_packed = jnp.concatenate([act_w.T, gate_w.T], axis=1).astype(io_dtype)
    b_packed = jnp.concatenate([act_b, gate_b]).reshape(1, 2 * D).astype(jnp.float32)
    x_io = x.astype(io_dtype)

    bt = _choose_row_tile(B, block_b)
    grid_b = pl.cdiv(B, bt)
    padded_b = grid_b * bt
    if padded_b != B:                                     # zero-pad ragged batch
        x_io = jnp.pad(x_io, ((0, padded_b - B), (0, 0)))

    io_bytes = jnp.dtype(io_dtype).itemsize
    # Double-buffered x / out tiles + double-buffered packed weight + bias.
    vmem_needed = ((2 * bt * D * io_bytes) * 2
                   + 2 * (2 * D * D) * io_bytes
                   + 2 * (2 * D) * 4)
    vmem_limit = int(min(max(2 * vmem_needed + (8 << 20), 32 << 20), 64 << 20))

    flops = 2 * padded_b * D * (2 * D) + 6 * padded_b * D
    transcendentals = padded_b * D                        # sigmoid
    bytes_accessed = (2 * padded_b * D + 2 * D * D) * io_bytes + (2 * D) * 4

    kernel = functools.partial(highway_kernel, activation=activation, d=D)

    out = pl.pallas_call(
        kernel,
        out_shape=jax.ShapeDtypeStruct((padded_b, D), io_dtype),
        grid=(grid_b,),
        in_specs=[
            pl.BlockSpec((bt, D), lambda i: (i, 0)),       # x: one row-block/step
            pl.BlockSpec((D, 2 * D), lambda i: (0, 0)),    # packed weight (resident)
            pl.BlockSpec((1, 2 * D), lambda i: (0, 0)),    # packed bias   (resident)
        ],
        out_specs=pl.BlockSpec((bt, D), lambda i: (i, 0)),
        compiler_params=pltpu.CompilerParams(
            dimension_semantics=("parallel",),             # v7x: shard batch over TCs
            vmem_limit_bytes=vmem_limit,
        ),
        cost_estimate=pl.CostEstimate(
            flops=flops,
            transcendentals=transcendentals,
            bytes_accessed=bytes_accessed,
        ),
    )(x_io, w_packed, b_packed)

    return out[:B] if padded_b != B else out


def highway_ref(x, act_w, act_b, gate_w, gate_b, *, activation=jax.nn.relu):
    hi = jax.lax.Precision.HIGHEST
    gate = jax.nn.sigmoid(jnp.dot(x, gate_w.T, precision=hi) + gate_b)
    act = activation(jnp.dot(x, act_w.T, precision=hi) + act_b)
    return act + (1.0 - gate) * x


if __name__ == "__main__":
    B = 512   # batch_size
    D = 128   # input_dim (lane-dense)

    key = jax.random.PRNGKey(0)
    kx, kaw, kab, kgw, kgb = jax.random.split(key, 5)

    # PyTorch-style Linear init: U(-1/sqrt(fan_in), 1/sqrt(fan_in))
    bound = 1.0 / (D ** 0.5)
    x = jax.random.normal(kx, (B, D), dtype=jnp.float32)
    act_w = jax.random.uniform(kaw, (D, D), minval=-bound, maxval=bound, dtype=jnp.float32)
    act_b = jax.random.uniform(kab, (D,), minval=-bound, maxval=bound, dtype=jnp.float32)
    gate_w = jax.random.uniform(kgw, (D, D), minval=-bound, maxval=bound, dtype=jnp.float32)
    gate_b = jax.random.uniform(kgb, (D,), minval=-bound, maxval=bound, dtype=jnp.float32)

    out = highway(x, act_w, act_b, gate_w, gate_b)
    out = jax.block_until_ready(out)
    assert out.shape == (B, D)

    # bf16 I/O path: validate against the f32 reference with a bf16-appropriate tol.
    ref = highway_ref(x, act_w, act_b, gate_w, gate_b)
    assert jnp.allclose(out.astype(jnp.float32), ref, atol=5e-2, rtol=5e-2), \
        "mismatch vs reference"

    print("KERNEL_OK")
</pallas_src>

<mosaic_0001>
module attributes {stable_mosaic.version = 11 : i64} {
  func.func @highway_kernel(%arg0: i32, %arg1: memref<256x128xbf16, #tpu.memory_space<vmem>>, %arg2: memref<128x256xbf16, #tpu.memory_space<vmem>>, %arg3: memref<1x256xf32, #tpu.memory_space<vmem>>, %arg4: memref<256x128xbf16, #tpu.memory_space<vmem>>) attributes {dimension_semantics = [#tpu.dimension_semantics<parallel>], iteration_bounds = array<i64: 2>, scalar_prefetch = 0 : i64, scratch_operands = 0 : i64, tpu.core_type = #tpu.core_type<tc>, window_params = [{transform_indices = @transform_0, window_bounds = array<i64: 256, 128>}, {pipeline_mode = #tpu.pipeline_mode<synchronous>, transform_indices = @transform_1, window_bounds = array<i64: 128, 256>}, {pipeline_mode = #tpu.pipeline_mode<synchronous>, transform_indices = @transform_2, window_bounds = array<i64: 1, 256>}, {transform_indices = @transform_3, window_bounds = array<i64: 256, 128>}]} {
    %c0 = arith.constant 0 : index
    %c0_0 = arith.constant 0 : index
    %0 = vector.load %arg1[%c0, %c0_0] : memref<256x128xbf16, #tpu.memory_space<vmem>>, vector<256x128xbf16>
    %c0_1 = arith.constant 0 : index
    %c0_2 = arith.constant 0 : index
    %1 = vector.load %arg2[%c0_1, %c0_2] : memref<128x256xbf16, #tpu.memory_space<vmem>>, vector<128x256xbf16>
    %cst = arith.constant dense<0.000000e+00> : vector<256x256xf32>
    %2 = tpu.matmul %0, %1, %cst {dimension_numbers = #tpu.dot_dimension_numbers<[1], [0], [0], [1], [0, 0, 1, 1], [], []>} : vector<256x128xbf16>, vector<128x256xbf16>, vector<256x256xf32> -> vector<256x256xf32>
    %c0_3 = arith.constant 0 : index
    %c0_4 = arith.constant 0 : index
    %3 = vector.load %arg3[%c0_3, %c0_4] : memref<1x256xf32, #tpu.memory_space<vmem>>, vector<1x256xf32>
    %4 = vector.broadcast %3 : vector<1x256xf32> to vector<256x256xf32>
    %5 = arith.addf %2, %4 : vector<256x256xf32>
    %6 = vector.extract_strided_slice %5 {offsets = [0, 0], sizes = [256, 128], strides = [1, 1]} : vector<256x256xf32> to vector<256x128xf32>
    %cst_5 = arith.constant 0.000000e+00 : f32
    %7 = vector.broadcast %cst_5 : f32 to vector<256x128xf32>
    %8 = arith.maximumf %6, %7 : vector<256x128xf32>
    %9 = vector.extract_strided_slice %5 {offsets = [0, 128], sizes = [256, 128], strides = [1, 1]} : vector<256x256xf32> to vector<256x128xf32>
    %10 = arith.negf %9 : vector<256x128xf32>
    %11 = math.exp %10 : vector<256x128xf32>
    %cst_6 = arith.constant 1.000000e+00 : f32
    %12 = vector.broadcast %cst_6 : f32 to vector<256x128xf32>
    %13 = arith.addf %12, %11 : vector<256x128xf32>
    %14 = arith.divf %12, %13 : vector<256x128xf32>
    %cst_7 = arith.constant 1.000000e+00 : f32
    %15 = vector.broadcast %cst_7 : f32 to vector<256x128xf32>
    %16 = arith.subf %15, %14 : vector<256x128xf32>
    %17 = arith.extf %0 : vector<256x128xbf16> to vector<256x128xf32>
    %18 = arith.mulf %16, %17 : vector<256x128xf32>
    %19 = arith.addf %8, %18 : vector<256x128xf32>
    %20 = arith.truncf %19 : vector<256x128xf32> to vector<256x128xbf16>
    %c0_8 = arith.constant 0 : index
    %c0_9 = arith.constant 0 : index
    %21 = vector.load %arg4[%c0_8, %c0_9] : memref<256x128xbf16, #tpu.memory_space<vmem>>, vector<256x128xbf16>
    tpu.vector_store %arg4[%c0_8, %c0_9], %20 {strides = array<i32>} : memref<256x128xbf16, #tpu.memory_space<vmem>>, vector<256x128xbf16>,
    return
  }
  func.func @transform_0(%arg0: i32) -> (i32, i32) {
    %c0_i32 = arith.constant 0 : i32
    %c0_i32_0 = arith.constant 0 : i32
    return %arg0, %c0_i32 : i32, i32
  }
  func.func @transform_1(%arg0: i32) -> (i32, i32) {
    %c0_i32 = arith.constant 0 : i32
    %c0_i32_0 = arith.constant 0 : i32
    %c0_i32_1 = arith.constant 0 : i32
    return %c0_i32, %c0_i32_0 : i32, i32
  }
  func.func @transform_2(%arg0: i32) -> (i32, i32) {
    %c0_i32 = arith.constant 0 : i32
    %c0_i32_0 = arith.constant 0 : i32
    %c0_i32_1 = arith.constant 0 : i32
    return %c0_i32, %c0_i32_0 : i32, i32
  }
  func.func @transform_3(%arg0: i32) -> (i32, i32) {
    %c0_i32 = arith.constant 0 : i32
    %c0_i32_0 = arith.constant 0 : i32
    return %arg0, %c0_i32 : i32, i32
  }
}

</mosaic_0001>

<bundles_post_ra>
// kernel: tpu_custom_call.1
= control target key start
LH: loop header
LB: loop body
LE: loop exit
PB: predicated region body
PF: predicated region fallthrough
CT: control target
= control target key end

     0   :  { %8 = vsyncpa [#allocation3], 0  ;;  %s3332_s0 = inlined_call_operand.hbm [shape: bf16[512,128], index: 0, kind: input, shape index: {}]   ;;  %s3333_s1 = inlined_call_operand.hbm [shape: bf16[128,256], index: 1, kind: input, shape index: {}]   ;;  %s3334_s2 = inlined_call_operand.hbm [shape: f32[1,256], index: 2, kind: input, shape index: {}]   ;;  %s3335_s3 = inlined_call_operand.hbm [shape: bf16[512,128], index: 3, kind: output, shape index: {}]  }
   0x1   :  { %10 = vsyncpa [#allocation3 + $0x1], 0 }
   0x2   :  { %11 = vsyncpa [#allocation6], 0 }
   0x3   :  { %12 = vsyncpa [#allocation4], 0 }
   0x4   :  { %14 = vsyncpa [#allocation4 + $0x1], 0  ;;  %s2286_s12 = smov 0   ;;  %s2288_s13 = smov 0  }
   0x5   :  { %s2290_s14 = smov 0   ;;  %s2292_s15 = smov 0  }
   0x6 LB: > { %s2307_s16 = sadd.s32 4294967295, %s2256_s15   ;;  %s1572_s17 = sadd.s32 4294967294, %s2256_s15   ;;  %s2256_s15 = sphi %s2292_s15, %s3405_s15   ;;  %s2252_s14 = sphi %s2290_s14, %s3404_s14   ;;  %s2248_s13 = sphi %s2288_s13, %s3403_s13   ;;  %s2244_s12 = sphi %s2286_s12, %s3402_s12  }
   0x7   : > { %p40_p0 = scmp.ne.s32.totalorder %s2248_s13, %s2244_s12  ;;  %p41_p1 = scmp.eq.s32.totalorder %s2307_s16, 0 }
   0x8   : > { %p106_p2 = scmp.eq.s32.totalorder %s2307_s16, 1  ;;  %p112_p3 = scmp.eq.s32.totalorder %s1572_s17, 1 }
   0x9   : > { %p2316_p4 = por %p41_p1, %p40_p0  ;;  %p1573_p5 = scmp.ge.s32.totalorder %s2256_s15, 1 }
   0xa   : > { %p2321_p6 = por %p112_p3, %p40_p0  ;;  %p119_p7 = scmp.lt.s32.totalorder %s2256_s15, 3 }
   0xb   : > { %s130_s22 = sshll.u32 %s3333_s1, 4  ;;  %s2258_s24 = smov [#allocation5]   ;;  %s131_s22 = int_to_ptr.hbm [resolvable:$true] %s130_s22 }
   0xc   : > { %p2329_p8 = pnand %p1573_p5, %p119_p7  ;;  %s132_s25 = sshll.u32 %s2258_s24, 4  ;;  %s133_s25 = int_to_ptr.vmem [resolvable:$true] %s132_s25 }
   0xd   : > { %s145_s28 = sshll.u32 %s3334_s2, 4  ;;  %s2259_s29 = smov 128   ;;  %s146_s28 = int_to_ptr.hbm [resolvable:$true] %s145_s28 }
   0xe   : > { %p1907_p9 = pneg %p2329_p8  ;;  %s2260_s30 = smov 8  }
   0xf   : > { %s2261_s4 = smov [#allocation7]   ;;  %s2342_s6 = sadd.s32 1, %s2256_s15  }
  0x10   : > { %p1908_p10 = pnand %p1907_p9, %p41_p1  ;;  %s147_s5 = sshll.u32 %s2261_s4, 4  ;;  %s148_s5 = int_to_ptr.vmem [resolvable:$true] %s147_s5 }
  0x11   : > { %s27_s7 = sadd.s32 1, %s2252_s14  ;;  %s24_s8 = ssub.s32 %s2256_s15, %s2342_s6 }
  0x12   : > { %1910 = dma.hbm_to_vmem [thread:$0]  (!%p1908_p10), %s131_s22, 2048, %s133_s25, [#allocation6], %s2259_s29, %s2259_s29, %s2260_s30  }
  0x13   : > { %1913 = dma.hbm_to_vmem [thread:$0]  (!%p1908_p10), %s146_s28, 32, %s148_s5, [#allocation6]  }
  0x14   : > { %p34_p12 = scmp.ne.s32.totalorder %s2252_s14, %s2248_s13  ;;  %p25_p13 = scmp.eq.s32.totalorder %s24_s8, 0 }
  0x15   : > { %p35_p0 = scmp.eq.s32.totalorder %s2256_s15, 0  ;;  %p1924_p5 = scmp.lt.s32.totalorder %s2256_s15, 2 }
  0x16   : > { %p2352_p3 = por %p106_p2, %p34_p12  ;;  %s158_s11 = sand.u32 1, %s2252_s14  }
  0x17   : > { %s2358_s10 = scalar_select %p25_p13, %s2252_s14, %s27_s7  }
  0x18   : > { %p36_p7 = por %p35_p0, %p34_p12  ;;  %s1577_s17 = sshll.u32 %s158_s11, 7 }
  0x19   : > { %s1750_s20 = sshll.u32 %s2256_s15, 7  ;;  %s162_s25 = scalar_lea.vmem [#allocation2], %s1577_s17 }
  0x1a   : > { %s167_s24 = scalar_lea.hbm %s3332_s0, %s1750_s20  ;;  %s170_s26 = sshll.u32 %s162_s25, 4  ;;  %s171_s26 = int_to_ptr.vmem [resolvable:$true] %s170_s26 }
  0x1b   : > { %s168_s27 = sshll.u32 %s167_s24, 4  ;;  %p2365_p2 = pnand %p1924_p5, %p36_p7  ;;  %s169_s27 = int_to_ptr.hbm [resolvable:$true] %s168_s27 }
  0x1c   : > { %s159_s29 = scalar_lea.sflag [#allocation3], %s158_s11  ;;  %s2156_s30 = sshra.s32 %s169_s27, 4  ;;  %s2157_s30 = int_to_ptr.hbm [resolvable:$true] %s2156_s30 }
  0x1d   : > { %s2158_s4 = scalar_lea.hbm %s2157_s30, 128  ;;  %p2160_p10 = pneg %p2365_p2 }
  0x1e   : > { %p2159_p9 = scmp.ne.s32.totalorder %s2157_s30, %s2158_s4  ;;  %s2163_s8 = scalar_lea.hbm %s3332_s0, 256 }
  0x1f   : > { %p2164_p0 = scmp.lt.s32.totalorder %s2157_s30, %s3332_s0  ;;  %p2165_p5 = scmp.lt.s32.totalorder %s2163_s8, %s2158_s4 }
  0x20   : > { %p2161_p12 = pnand %p2160_p10, %p2159_p9 }
  0x21   : > { %p2166_p7 = por %p2165_p5, %p2164_p0 }
  0x22   : > { %p2162_p13 = pneg %p2161_p12 }
  0x24   : > { %p2167_p11 = pnand %p2166_p7, %p2162_p13 }
  0x26   : > { %2170 = shalt.err (!%p2167_p11)
}
  0x27   : > { %s2262_s11 = smov 64   ;;  %s2263_s21 = smov 4  }
  0x28   : > { %1917 = dma.hbm_to_vmem [thread:$0]  (!%p2365_p2), %s169_s27, 2048, %s171_s26, %s159_s29, %s2262_s11, %s2262_s11, %s2263_s21  }
  0x29   : > { %182 = sbr.rel (%p2329_p8) target bundleno = 419 (0x1a3), region = 32  ;;  %s2382_s22 = sand.u32 (!%p2329_p8), 1, %s2248_s13  }
  0x2a   : > { %s1581_s24 = sshll.u32 (!%p2329_p8), %s2382_s22, 7  ;;  %s185_s25 = scalar_lea.sflag (!%p2329_p8), [#allocation3], %s2382_s22 }
  0x2b   : > { %s2388_s30 = scalar_lea.vmem (!%p2329_p8), [#allocation2], %s1581_s24 }
  0x2e   : > { %2231 = dma.done.wait (%p2316_p4), %s185_s25, 2048  }
  0x2f   : > { %2233 = vsyncadd (%p2316_p4), %s185_s25, 4294965248 }
  0x30   : > { %2235 = dma.done.wait (%p41_p1), [#allocation6], 2080  }
  0x31   : > { %2237 = vsyncadd (%p41_p1), [#allocation6], 4294965216  ;;  %v1781_v0 = vld [vmem:[#allocation5 + $0x74] sm:$0xf]  ;;  %v1709_v1 = vld [vmem:[#allocation5 + $0x78] sm:$0xf0] }
  0x32   : > { %v1779_v2 = vld [vmem:[#allocation5 + $0x64] sm:$0xf]  ;;  %v1712_v3 = vor.u32 %v1781_v0, %v1709_v1  ;;  %v1701_v4 = vld [vmem:[#allocation5 + $0x68] sm:$0xf0]  ;;  %v1777_v6 = vld [vmem:[#allocation5 + $0x54] sm:$0xf] }
  0x33   : > { %v1704_v5 = vor.u32 %v1779_v2, %v1701_v4  ;;  %v1693_v7 = vld [vmem:[#allocation5 + $0x58] sm:$0xf0]  ;;  %v1707_v8 = vld [vmem:[#allocation5 + $0x70] sm:$0xf]  ;;  %v1782_v9 = vld [vmem:[#allocation5 + $0x74] sm:$0xf0] }
  0x34   : > { %543 = vmatpush.bf16.msra.mxu1 %v1712_v3  ;;  %1887 = vmatpush.bf16.msra.mxu3 %v1712_v3  ;;  %v1708_v10 = vor.u32 %v1782_v9, %v1707_v8  ;;  %v1699_v11 = vld [vmem:[#allocation5 + $0x60] sm:$0xf]  ;;  %v1780_v12 = vld [vmem:[#allocation5 + $0x64] sm:$0xf0]  ;;  %v1696_v13 = vor.u32 %v1777_v6, %v1693_v7  ;;  %v1775_v14 = vld [vmem:[#allocation5 + $0x44] sm:$0xf] }
  0x35   : > { %v1685_v15 = vld [vmem:[#allocation5 + $0x48] sm:$0xf0]  ;;  %v1700_v16 = vor.u32 %v1780_v12, %v1699_v11  ;;  %v1691_v17 = vld [vmem:[#allocation5 + $0x50] sm:$0xf]  ;;  %v1778_v18 = vld [vmem:[#allocation5 + $0x54] sm:$0xf0] }
  0x36   : > { %1879 = vmatpush.bf16.msra.mxu2 %v1708_v10  ;;  %454 = vmatpush.bf16.msra.mxu0 %v1708_v10  ;;  %v1688_v19 = vor.u32 %v1775_v14, %v1685_v15  ;;  %v1773_v20 = vld [vmem:[#allocation5 + $0x34] sm:$0xf]  ;;  %v1677_v21 = vld [vmem:[#allocation5 + $0x38] sm:$0xf0]  ;;  %v1692_v22 = vor.u32 %v1778_v18, %v1691_v17  ;;  %v1683_v23 = vld [vmem:[#allocation5 + $0x40] sm:$0xf] }
  0x37   : > { %v1776_v24 = vld [vmem:[#allocation5 + $0x44] sm:$0xf0]  ;;  %v1680_v25 = vor.u32 %v1773_v20, %v1677_v21  ;;  %v1771_v26 = vld [vmem:[#allocation5 + $0x24] sm:$0xf]  ;;  %v1669_v27 = vld [vmem:[#allocation5 + $0x28] sm:$0xf0] }
  0x38   : > { %544 = vmatpush.bf16.msra.mxu1 %v1704_v5  ;;  %1888 = vmatpush.bf16.msra.mxu3 %v1704_v5  ;;  %v1684_v28 = vor.u32 %v1776_v24, %v1683_v23  ;;  %v1675_v29 = vld [vmem:[#allocation5 + $0x30] sm:$0xf]  ;;  %v1774_v30 = vld [vmem:[#allocation5 + $0x34] sm:$0xf0]  ;;  %v1672_v31 = vor.u32 %v1771_v26, %v1669_v27  ;;  %v1769_v32 = vld [vmem:[#allocation5 + $0x14] sm:$0xf] }
  0x39   : > { %v1661_v33 = vld [vmem:[#allocation5 + $0x18] sm:$0xf0]  ;;  %v1676_v34 = vor.u32 %v1774_v30, %v1675_v29  ;;  %v1667_v35 = vld [vmem:[#allocation5 + $0x20] sm:$0xf]  ;;  %v1772_v36 = vld [vmem:[#allocation5 + $0x24] sm:$0xf0] }
  0x3a   : > { %1880 = vmatpush.bf16.msra.mxu2 %v1700_v16  ;;  %455 = vmatpush.bf16.msra.mxu0 %v1700_v16  ;;  %v1664_v37 = vor.u32 %v1769_v32, %v1661_v33  ;;  %v1767_v38 = vld [vmem:[#allocation5 + $0x4] sm:$0xf]  ;;  %v1653_v39 = vld [vmem:[#allocation5 + $0x8] sm:$0xf0]  ;;  %v1668_v40 = vor.u32 %v1772_v36, %v1667_v35  ;;  %v1659_v41 = vld [vmem:[#allocation5 + $0x10] sm:$0xf] }
  0x3b   : > { %v1770_v42 = vld [vmem:[#allocation5 + $0x14] sm:$0xf0]  ;;  %v1656_v43 = vor.u32 %v1767_v38, %v1653_v39  ;;  %v1651_v45 = vld [vmem:[#allocation5] sm:$0xf]  ;;  %v1768_v46 = vld [vmem:[#allocation5 + $0x4] sm:$0xf0] }
  0x3c   : > { %545 = vmatpush.bf16.msra.mxu1 %v1696_v13  ;;  %1889 = vmatpush.bf16.msra.mxu3 %v1696_v13  ;;  %v1660_v44 = vor.u32 %v1770_v42, %v1659_v41  ;;  %v1751_v47 = vld [vmem:[%s2388_s30] sm:$0xff]  ;;  %v1652_v49 = vor.u32 %v1768_v46, %v1651_v45  ;;  %v1752_v50 = vld [vmem:[%s2388_s30 + $0x8] sm:$0xff]  ;;  %v1753_v52 = vld [vmem:[%s2388_s30 + $0x10] sm:$0xff]  ;;  %s2599_s18 = scalar_lea.vmem [#allocation8], %s1581_s24  ;;  %s1783_s23 = sshll.u32 %s2307_s16, 7 }
  0x3d   : > { %v1759_v48 = vld [vmem:[%s2388_s30 + $0x40] sm:$0xff]  ;;  %v1760_v51 = vld [vmem:[%s2388_s30 + $0x48] sm:$0xff]  ;;  %v1761_v53 = vld [vmem:[%s2388_s30 + $0x50] sm:$0xff]  ;;  %s1476_s28 = scalar_lea.hbm %s3335_s3, %s1783_s23  ;;  %s1477_s16 = sshll.u32 %s2599_s18, 4  ;;  %s1478_s16 = int_to_ptr.vmem [resolvable:$true] %s1477_s16 }
  0x3e   : > { %1881 = vmatpush.bf16.msra.mxu2 %v1692_v22  ;;  %456 = vmatpush.bf16.msra.mxu0 %v1692_v22  ;;  %v1754_v54 = vld [vmem:[%s2388_s30 + $0x18] sm:$0xff]  ;;  %v1755_v56 = vld [vmem:[%s2388_s30 + $0x20] sm:$0xff]  ;;  %v1756_v58 = vld [vmem:[%s2388_s30 + $0x28] sm:$0xff]  ;;  %s1479_s29 = sshll.u32 %s1476_s28, 4  ;;  %s1465_s4 = scalar_lea.sflag [#allocation4], %s2382_s22  ;;  %s1480_s29 = int_to_ptr.hbm [resolvable:$true] %s1479_s29 }
  0x3f   : > { %v1762_v55 = vld [vmem:[%s2388_s30 + $0x58] sm:$0xff]  ;;  %v1763_v57 = vld [vmem:[%s2388_s30 + $0x60] sm:$0xff]  ;;  %v1764_v59 = vld [vmem:[%s2388_s30 + $0x68] sm:$0xff]  ;;  %s2200_s5 = sshra.s32 %s1480_s29, 4  ;;  %s2206_s20 = scalar_lea.hbm %s3335_s3, 256  ;;  %s2201_s5 = int_to_ptr.hbm [resolvable:$true] %s2200_s5 }
  0x40   : > { %546 = vmatpush.bf16.msra.mxu1 %v1688_v19  ;;  %1890 = vmatpush.bf16.msra.mxu3 %v1688_v19  ;;  %v1757_v60 = vld [vmem:[%s2388_s30 + $0x30] sm:$0xff]  ;;  %v1758_v62 = vld [vmem:[%s2388_s30 + $0x38] sm:$0xff]  ;;  %v272_v0 = vld [vmem:[#allocation7] sm:$0x3]  ;;  %s2202_s7 = scalar_lea.hbm %s2201_s5, 128  ;;  %p2207_p11 = scmp.lt.s32.totalorder %s2201_s5, %s3335_s3 }
  0x41   : > { %v1765_v61 = vld [vmem:[%s2388_s30 + $0x70] sm:$0xff]  ;;  %v1766_v63 = vld [vmem:[%s2388_s30 + $0x78] sm:$0xff]  ;;  %v2414_v1 = vperm.slane %v272_v0, 1  ;;  %v2421_v14 = vperm.slane %v272_v0, 0  ;;  %v2426_v17 = vld [vmem:[%s2388_s30] sm:$0xff]   ;;  %p2203_p1 = scmp.ne.s32.totalorder %s2201_s5, %s2202_s7  ;;  %p2208_p2 = scmp.lt.s32.totalorder %s2206_s20, %s2202_s7 }
  0x42   : > { %1882 = vmatpush.bf16.msra.mxu2 %v1684_v28  ;;  %457 = vmatpush.bf16.msra.mxu0 %v1684_v28  ;;  %v2429_v20 = vld [vmem:[%s2388_s30 + $0x40] sm:$0xff]   ;;  %v1304_v27 = vunpack.c.l.bf16 %v2426_v17  ;;  %v1305_v39 = vunpack.c.h.bf16 %v2426_v17 }
  0x43   : > { %v1320_v32 = vunpack.c.l.bf16 %v2429_v20  ;;  %p2204_p4 = pnand %p2203_p1, %p2352_p3  ;;  %p2209_p9 = por %p2208_p2, %p2207_p11 }
  0x44   : > { %547 = vmatpush.bf16.msra.mxu1 %v1680_v25  ;;  %1891 = vmatpush.bf16.msra.mxu3 %v1680_v25 }
  0x45   : > { %p2205_p8 = pneg %p2204_p4 }
  0x46   : > { %1883 = vmatpush.bf16.msra.mxu2 %v1676_v34  ;;  %458 = vmatpush.bf16.msra.mxu0 %v1676_v34 }
  0x47   : > { %p2210_p10 = pnand %p2209_p9, %p2205_p8 }
  0x48   : > { %548 = vmatpush.bf16.msra.mxu1 %v1672_v31  ;;  %1892 = vmatpush.bf16.msra.mxu3 %v1672_v31 }
  0x4a   : > { %1884 = vmatpush.bf16.msra.mxu2 %v1668_v40  ;;  %459 = vmatpush.bf16.msra.mxu0 %v1668_v40  ;;  %v2454_v40 = vld [vmem:[%s2388_s30 + $0x8] sm:$0xff]  }
  0x4c   : > { %549 = vmatpush.bf16.msra.mxu1 %v1664_v37  ;;  %1893 = vmatpush.bf16.msra.mxu3 %v1664_v37 }
  0x4e   : > { %1885 = vmatpush.bf16.msra.mxu2 %v1660_v44  ;;  %460 = vmatpush.bf16.msra.mxu0 %v1660_v44 }
  0x50   : > { %550 = vmatpush.bf16.msra.mxu1 %v1656_v43  ;;  %1894 = vmatpush.bf16.msra.mxu3 %v1656_v43 }
  0x52   : > { %1886 = vmatpush.bf16.msra.mxu2 %v1652_v49  ;;  %461 = vmatpush.bf16.msra.mxu0 %v1652_v49 }
  0x53   : > { %551 = vmatmul.bf16.vlgmr.msra.gmra.mxu1 %v1751_v47  ;;  %591 = vmatmul.bf16.vlgmr.msra.gmra.mxu3 %v1759_v48 }
  0x55   : > { %502 = vmatmul.bf16.vlgmr.msra.gmra.mxu2 %v1759_v48  ;;  %462 = vmatmul.bf16.vlgmr.msra.gmra.mxu0 %v1751_v47 }
  0x63   : > { %556 = vmatmul.bf16.gmra.mxu1 %v1752_v50  ;;  %596 = vmatmul.bf16.gmra.mxu3 %v1760_v51 }
  0x65   : > { %507 = vmatmul.bf16.gmra.mxu2 %v1760_v51  ;;  %467 = vmatmul.bf16.gmra.mxu0 %v1752_v50  ;;  %v1321_v51 = vunpack.c.h.bf16 %v2429_v20 }
  0x73   : > { %561 = vmatmul.bf16.gmra.mxu1 %v1753_v52  ;;  %601 = vmatmul.bf16.gmra.mxu3 %v1761_v53 }
  0x75   : > { %512 = vmatmul.bf16.gmra.mxu2 %v1761_v53  ;;  %472 = vmatmul.bf16.gmra.mxu0 %v1753_v52  ;;  %v1306_v52 = vunpack.c.l.bf16 %v2454_v40 }
  0x83   : > { %566 = vmatmul.bf16.gmra.mxu1 %v1754_v54  ;;  %606 = vmatmul.bf16.gmra.mxu3 %v1762_v55 }
  0x85   : > { %517 = vmatmul.bf16.gmra.mxu2 %v1762_v55  ;;  %477 = vmatmul.bf16.gmra.mxu0 %v1754_v54 }
  0x93   : > { %571 = vmatmul.bf16.gmra.mxu1 %v1755_v56  ;;  %611 = vmatmul.bf16.gmra.mxu3 %v1763_v57 }
  0x95   : > { %522 = vmatmul.bf16.gmra.mxu2 %v1763_v57  ;;  %482 = vmatmul.bf16.gmra.mxu0 %v1755_v56 }
  0xa3   : > { %576 = vmatmul.bf16.gmra.mxu1 %v1756_v58  ;;  %616 = vmatmul.bf16.gmra.mxu3 %v1764_v59 }
  0xa5   : > { %527 = vmatmul.bf16.gmra.mxu2 %v1764_v59  ;;  %487 = vmatmul.bf16.gmra.mxu0 %v1756_v58 }
  0xb3   : > { %581 = vmatmul.bf16.gmra.mxu1 %v1757_v60  ;;  %621 = vmatmul.bf16.gmra.mxu3 %v1765_v61 }
  0xb5   : > { %532 = vmatmul.bf16.gmra.mxu2 %v1765_v61  ;;  %492 = vmatmul.bf16.gmra.mxu0 %v1757_v60 }
  0xc3   : > { %586 = vmatmul.bf16.gmra.mxu1 %v1758_v62  ;;  %626 = vmatmul.bf16.gmra.mxu3 %v1766_v63 }
  0xc5   : > { %537 = vmatmul.bf16.gmra.mxu2 %v1766_v63  ;;  %497 = vmatmul.bf16.gmra.mxu0 %v1758_v62 }
  0xd0   : > { %v552_v2 = vpop.f32.mrf.mxu1 }
  0xd1   : > { %v553_v3 = vadd.f32 %v552_v2, %v2414_v1 }
  0xd2   : > { %v463_v7 = vpop.f32.mrf.mxu0 }
  0xd3   : > { %v1713_v4 = vmul.f32 -1.442695, %v553_v3  ;;  %v2433_v24 = vadd.f32 %v463_v7, %v2421_v14 }
  0xd5   : > { %1968 = vpow2.f32 %v1713_v4  ;;  %v632_v38 = vmax.f32 %v2433_v24, 0.0 }
  0xd6   : > { %v592_v5 = vpop.f32.mrf.mxu3 }
  0xd7   : > { %v593_v6 = vadd.f32 %v592_v5, %v2414_v1 }
  0xd8   : > { %v554_v8 = vpop.f32.mrf.mxu1  ;;  %v503_v18 = vpop.f32.mrf.mxu2 }
  0xd9   : > { %v1729_v9 = vmul.f32 -1.442695, %v593_v6  ;;  %v555_v10 = vadd.f32 %v554_v8, %v2414_v1  ;;  %v2439_v28 = vadd.f32 %v503_v18, %v2421_v14 }
  0xda   : > { %v465_v25 = vpop.f32.mrf.mxu0 }
  0xdb   : > { %v1969_v11 = vpop.eup %1968  ;;  %1970 = vpow2.f32 %v1729_v9  ;;  %v1714_v12 = vmul.f32 -1.442695, %v555_v10  ;;  %v2448_v36 = vadd.f32 %v465_v25, %v2421_v14  ;;  %v648_v42 = vmax.f32 %v2439_v28, 0.0 }
  0xdc   : > { %v2419_v13 = vadd.f32 1.0, %v1969_v11 }
  0xdd   : > { %1972 = vpow2.f32 %v1714_v12  ;;  %v633_v50 = vmax.f32 %v2448_v36, 0.0 }
  0xde   : > { %1974 = vrcp.f32 %v2419_v13  ;;  %v594_v15 = vpop.f32.mrf.mxu3  ;;  %v801_v31 = vand.u32 2147483647, %v2419_v13  ;;  %v803_v35 = vand.u32 2147483648, %v2419_v13  ;;  %vm797_vm0 = vweird.f32 %v2419_v13 }
  0xdf   : > { %v595_v16 = vadd.f32 %v594_v15, %v2414_v1 }
  0xe0   : > { %v557_v19 = vpop.f32.mrf.mxu1  ;;  %vm2461_vm1 = vcmp.eq.f32.partialorder %v801_v31, 8.507059e+37  ;;  %v804_v49 = vor.u32 1.1754944e-38, %v803_v35  ;;  %v505_v57 = vpop.f32.mrf.mxu2 }
  0xe1   : > { %v1971_v21 = vpop.eup %1970  ;;  %v1730_v22 = vmul.f32 -1.442695, %v595_v16  ;;  %v558_v23 = vadd.f32 %v557_v19, %v2414_v1  ;;  %v2489_v8 = vadd.f32 %v505_v57, %v2421_v14 }
  0xe2   : > { %v2435_v26 = vadd.f32 1.0, %v1971_v21  ;;  %v468_v5 = vpop.f32.mrf.mxu0 }
  0xe3   : > { %v1973_v29 = vpop.eup %1972  ;;  %1976 = vpow2.f32 %v1730_v22  ;;  %v1715_v30 = vmul.f32 -1.442695, %v558_v23  ;;  %v2492_v9 = vadd.f32 %v468_v5, %v2421_v14 }
  0xe4   : > { %v1975_v33 = vpop.eup %1974  ;;  %1978 = vrcp.f32 %v2435_v26  ;;  %v2444_v34 = vadd.f32 1.0, %v1973_v29  ;;  %v1043_v43 = vand.u32 2147483648, %v2435_v26  ;;  %v1041_v47 = vand.u32 2147483647, %v2435_v26 }
  0xe5   : > { %v793_v37 = vmul.f32 %v1975_v33, %v2419_v13  ;;  %1980 = vpow2.f32 %v1715_v30  ;;  %vm798_vm2 = vweird.f32 %v1975_v33  ;;  %vm1037_vm3 = vweird.f32 %v2435_v26 }
  0xe6   : > { %1982 = vrcp.f32 %v2444_v34  ;;  %v597_v41 = vpop.f32.mrf.mxu3  ;;  %v1044_v60 = vor.u32 1.1754944e-38, %v1043_v43  ;;  %v816_v61 = vand.u32 2147483647, %v2444_v34  ;;  %v818_v62 = vand.u32 2147483648, %v2444_v34  ;;  %vm799_vm5 = vmor %vm797_vm0, %vm798_vm2 }
  0xe7   : > { %v794_v44 = vsub.f32 1.0, %v793_v37  ;;  %v598_v45 = vadd.f32 %v597_v41, %v2414_v1  ;;  %vm2476_vm4 = vcmp.eq.f32.partialorder %v1041_v47, 8.507059e+37  ;;  %vm812_vm6 = vweird.f32 %v2444_v34 }
  0xe8   : > { %v559_v48 = vpop.f32.mrf.mxu1  ;;  %v819_v16 = vor.u32 1.1754944e-38, %v818_v62  ;;  %vm2501_vm8 = vcmp.eq.f32.partialorder %v816_v61, 8.507059e+37  ;;  %v649_v29 = vmax.f32 %v2489_v8, 0.0  ;;  %v634_v31 = vmax.f32 %v2492_v9, 0.0  ;;  %v508_v28 = vpop.f32.mrf.mxu2 }
  0xe9   : > { %v1977_v53 = vpop.eup %1976  ;;  %v1731_v54 = vmul.f32 -1.442695, %v598_v45  ;;  %v560_v55 = vadd.f32 %v559_v48, %v2414_v1  ;;  %v795_v56 = vmul.f32 %v1975_v33, %v794_v44 }
  0xea   : > { %v1979_v58 = vpop.eup %1978  ;;  %v2471_v59 = vadd.f32 1.0, %v1977_v53 }
  0xeb   : > { %v1981_v63 = vpop.eup %1980  ;;  %v1033_v0 = vmul.f32 %v1979_v58, %v2435_v26  ;;  %1984 = vpow2.f32 %v1731_v54  ;;  %v1716_v2 = vmul.f32 -1.442695, %v560_v55  ;;  %v796_v3 = vadd.f32 %v1975_v33, %v795_v56 }
  0xec   : > { %v2480_v6 = vpop.eup %1982  ;;  %1986 = vrcp.f32 %v2471_v59  ;;  %v2483_v7 = vadd.f32 1.0, %v1981_v63  ;;  %vm1038_vm7 = vweird.f32 %v1979_v58  ;;  %v1056_v30 = vand.u32 2147483647, %v2471_v59 }
  0xed   : > { %v1034_v10 = vsub.f32 1.0, %v1033_v0  ;;  %v808_v11 = vmul.f32 %v2480_v6, %v2444_v34  ;;  %1988 = vpow2.f32 %v1716_v2  ;;  %v800_v12 = vsel %vm799_vm5, %v1975_v33, %v796_v3  ;;  %vm1039_vm10 = vmor %vm1037_vm3, %vm1038_vm7  ;;  %v470_v2 = vpop.f32.mrf.mxu0 }
  0xee   : > { %1990 = vrcp.f32 %v2483_v7  ;;  %v805_v13 = vsel %vm2461_vm1, %v804_v49, %v800_v12  ;;  %v599_v15 = vpop.f32.mrf.mxu3  ;;  %vm813_vm9 = vweird.f32 %v2480_v6  ;;  %v1058_v43 = vand.u32 2147483648, %v2471_v59 }
  0xef   : > { %v809_v18 = vsub.f32 1.0, %v808_v11  ;;  %v1272_v19 = vsub.f32 1.0, %v805_v13  ;;  %v1035_v21 = vmul.f32 %v1979_v58, %v1034_v10  ;;  %v600_v22 = vadd.f32 %v599_v15, %v2414_v1  ;;  %vm814_vm14 = vmor %vm812_vm6, %vm813_vm9 }
  0xf0   : > { %v562_v25 = vpop.f32.mrf.mxu1  ;;  %vm1052_vm11 = vweird.f32 %v2471_v59  ;;  %vm827_vm12 = vweird.f32 %v2483_v7  ;;  %v831_v47 = vand.u32 2147483647, %v2483_v7  ;;  %vm2531_vm13 = vcmp.eq.f32.partialorder %v1056_v30, 8.507059e+37 }
  0xf1   : > { %v1985_v33 = vpop.eup %1984  ;;  %v1036_v35 = vadd.f32 %v1979_v58, %v1035_v21  ;;  %v1732_v37 = vmul.f32 -1.442695, %v600_v22  ;;  %v563_v41 = vadd.f32 %v562_v25, %v2414_v1  ;;  %v810_v46 = vmul.f32 %v2480_v6, %v809_v18 }
  0xf2   : > { %v2511_v44 = vpop.eup %1986  ;;  %v2513_v45 = vadd.f32 1.0, %v1985_v33  ;;  %v1336_v53 = vmul.f32 %v1304_v27, %v1272_v19  ;;  %vm2543_vm0 = vcmp.eq.f32.partialorder %v831_v47, 8.507059e+37  ;;  %v833_v5 = vand.u32 2147483648, %v2483_v7 }
  0xf3   : > { %v1989_v48 = vpop.eup %1988  ;;  %v1048_v49 = vmul.f32 %v2511_v44, %v2471_v59  ;;  %v1040_v54 = vsel %vm1039_vm10, %v1979_v58, %v1036_v35  ;;  %1992 = vpow2.f32 %v1732_v37  ;;  %v1717_v57 = vmul.f32 -1.442695, %v563_v41 }
  0xf4   : > { %v1991_v55 = vpop.eup %1990  ;;  %1994 = vrcp.f32 %v2513_v45  ;;  %v2527_v26 = vadd.f32 1.0, %v1989_v48  ;;  %v1045_v56 = vsel %vm2476_vm4, %v1044_v60, %v1040_v54  ;;  %v811_v27 = vadd.f32 %v2480_v6, %v810_v46 }
  0xf5   : > { %v1049_v62 = vsub.f32 1.0, %v1048_v49  ;;  %v823_v63 = vmul.f32 %v1991_v55, %v2483_v7  ;;  %v1288_v0 = vsub.f32 1.0, %v1045_v56  ;;  %vm1053_vm15 = vweird.f32 %v2511_v44 }
  0xf6   : > { %1996 = vrcp.f32 %v2527_v26  ;;  %v1059_v58 = vor.u32 1.1754944e-38, %v1058_v43  ;;  %v602_v60 = vpop.f32.mrf.mxu3  ;;  %v815_v4 = vsel %vm814_vm14, %v2480_v6, %v811_v27  ;;  %v1368_v18 = vadd.f32 %v1336_v53, %v632_v38  ;;  %vm1054_vm2 = vmor %vm1052_vm11, %vm1053_vm15 }
  0xf7   : > { %v824_v3 = vsub.f32 1.0, %v823_v63  ;;  %1998 = vpow2.f32 %v1717_v57  ;;  %v1352_v10 = vmul.f32 %v1320_v32, %v1288_v0  ;;  %v820_v34 = vsel %vm2501_vm8, %v819_v16, %v815_v4 }
  0xf8   : > { %v1050_v11 = vmul.f32 %v2511_v44, %v1049_v62  ;;  %v603_v12 = vadd.f32 %v602_v60, %v2414_v1  ;;  %v564_v13 = vpop.f32.mrf.mxu1  ;;  %v1273_v19 = vsub.f32 1.0, %v820_v34  ;;  %vm828_vm1 = vweird.f32 %v1991_v55  ;;  %v2611_v62 = vld [vmem:[%s2388_s30 + $0x48] sm:$0xff]  }
  0xf9   : > { %v1993_v15 = vpop.eup %1992  ;;  %v565_v6 = vadd.f32 %v564_v13, %v2414_v1  ;;  %v825_v21 = vmul.f32 %v1991_v55, %v824_v3  ;;  %v1384_v35 = vadd.f32 %v1352_v10, %v648_v42  ;;  %v834_v41 = vor.u32 1.1754944e-38, %v833_v5  ;;  %vm829_vm3 = vmor %vm827_vm12, %vm828_vm1 }
  0xfa   : > { %v2558_v22 = vpop.eup %1994  ;;  %v2560_v25 = vadd.f32 1.0, %v1993_v15  ;;  %v1051_v32 = vadd.f32 %v2511_v44, %v1050_v11  ;;  %v1733_v16 = vmul.f32 -1.442695, %v603_v12  ;;  %v1337_v30 = vmul.f32 %v1305_v39, %v1273_v19 }
  0xfb   : > { %v1063_v23 = vmul.f32 %v2558_v22, %v2513_v45  ;;  %v1718_v24 = vmul.f32 -1.442695, %v565_v6  ;;  %v826_v38 = vadd.f32 %v1991_v55, %v825_v21  ;;  %vm1067_vm4 = vweird.f32 %v2513_v45 }
  0xfc   : > { %v2571_v33 = vpop.eup %1996  ;;  %2000 = vrcp.f32 %v2560_v25  ;;  %v1055_v37 = vsel %vm1054_vm2, %v2511_v44, %v1051_v32  ;;  %v1369_v59 = vadd.f32 %v1337_v30, %v633_v50  ;;  %v2591_v50 = vadd.f32 %v508_v28, %v2421_v14 }
  0xfd   : > { %v1999_v43 = vpop.eup %1998  ;;  %v1064_v17 = vsub.f32 1.0, %v1063_v23  ;;  %v838_v39 = vmul.f32 %v2571_v33, %v2527_v26  ;;  %v1060_v46 = vsel %vm2531_vm13, %v1059_v58, %v1055_v37  ;;  %2002 = vpow2.f32 %v1733_v16 }
  0xfe   : > { %v2586_v42 = vadd.f32 1.0, %v1999_v43  ;;  %v1289_v44 = vsub.f32 1.0, %v1060_v46  ;;  %v830_v47 = vsel %vm829_vm3, %v1991_v55, %v826_v38  ;;  %v1787_v48 = vpack.c.bf16 %v1369_v59, %v1368_v18  ;;  %v604_v49 = vpop.f32.mrf.mxu3 }
  0xff   : > { %2004 = vpow2.f32 %v1718_v24  ;;  %v835_v36 = vsel %vm2543_vm0, %v834_v41, %v830_v47  ;;  %v1065_v54 = vmul.f32 %v2558_v22, %v1064_v17  ;;  %vm1068_vm5 = vweird.f32 %v2558_v22 }
 0x100   : > { %2006 = vrcp.f32 %v2586_v42  ;;  %v1353_v7 = vmul.f32 %v1321_v51, %v1289_v44  ;;  %v1274_v53 = vsub.f32 1.0, %v835_v36  ;;  %v567_v56 = vpop.f32.mrf.mxu1  ;;  %1788 = vst [vmem:[%s2599_s18] sm:$0xff] %v1787_v48   ;;  %v1071_v55 = vand.u32 2147483647, %v2513_v45  ;;  %vm1069_vm6 = vmor %vm1067_vm4, %vm1068_vm5 }
 0x101   : > { %v1073_v57 = vand.u32 2147483648, %v2513_v45  ;;  %v839_v20 = vsub.f32 1.0, %v838_v39  ;;  %v1066_v63 = vadd.f32 %v2558_v22, %v1065_v54  ;;  %v605_v0 = vadd.f32 %v604_v49, %v2414_v1 }
 0x102   : > { %v2606_v61 = vpop.eup %2000  ;;  %v1385_v51 = vadd.f32 %v1353_v7, %v649_v29  ;;  %v1338_v58 = vmul.f32 %v1306_v52, %v1274_v53  ;;  %v568_v60 = vadd.f32 %v567_v56, %v2414_v1  ;;  %vm1072_vm7 = vcmp.eq.f32.partialorder %v1071_v55, 8.507059e+37 }
 0x103   : > { %v1078_v27 = vmul.f32 %v2606_v61, %v2560_v25  ;;  %v1074_v45 = vor.u32 1.1754944e-38, %v1073_v57  ;;  %v2003_v8 = vpop.eup %2002  ;;  %v1070_v3 = vsel %vm1069_vm6, %v2558_v22, %v1066_v63  ;;  %v1734_v4 = vmul.f32 -1.442695, %v605_v0  ;;  %v510_v22 = vpop.f32.mrf.mxu2 }
 0x104   : > { %v1827_v29 = vpack.c.bf16 %v1385_v51, %v1384_v35  ;;  %v2621_v10 = vadd.f32 1.0, %v2003_v8  ;;  %v1322_v11 = vunpack.c.l.bf16 %v2611_v62  ;;  %v1719_v12 = vmul.f32 -1.442695, %v568_v60  ;;  %v473_v60 = vpop.f32.mrf.mxu0 }
 0x105   : > { %v2005_v5 = vpop.eup %2004  ;;  %v1075_v34 = vsel %vm1072_vm7, %v1074_v45, %v1070_v3  ;;  %2008 = vpow2.f32 %v1734_v4  ;;  %v471_v18 = vadd.f32 %v470_v2, %v2421_v14  ;;  %v1079_v19 = vsub.f32 1.0, %v1078_v27 }
 0x106   : > { %v2624_v52 = vpop.eup %2006  ;;  %1871 = vst [vmem:[%s2599_s18 + $0x40] sm:$0xff] %v1827_v29   ;;  %v2627_v13 = vadd.f32 1.0, %v2005_v5  ;;  %v1290_v15 = vsub.f32 1.0, %v1075_v34  ;;  %2010 = vrcp.f32 %v2621_v10  ;;  %v840_v21 = vmul.f32 %v2571_v33, %v839_v20  ;;  %v607_v39 = vpop.f32.mrf.mxu3 }
 0x107   : > { %v853_v6 = vmul.f32 %v2624_v52, %v2586_v42  ;;  %v2637_v32 = vadd.f32 %v1338_v58, %v634_v31  ;;  %v650_v16 = vmax.f32 %v2591_v50, 0.0  ;;  %vm843_vm8 = vweird.f32 %v2571_v33 }
 0x108   : > { %2012 = vrcp.f32 %v2627_v13  ;;  %v841_v23 = vadd.f32 %v2571_v33, %v840_v21  ;;  %vm842_vm9 = vweird.f32 %v2527_v26  ;;  %v846_v30 = vand.u32 2147483647, %v2527_v26  ;;  %v569_v54 = vpop.f32.mrf.mxu1  ;;  %v2706_v21 = vld [vmem:[%s2388_s30 + $0x10] sm:$0xff]  }
 0x109   : > { %2014 = vpow2.f32 %v1719_v12  ;;  %v1354_v24 = vmul.f32 %v1322_v11, %v1290_v15  ;;  %v635_v38 = vmax.f32 %v471_v18, 0.0  ;;  %vm2644_vm10 = vmor %vm842_vm9, %vm843_vm8  ;;  %v848_v9 = vand.u32 2147483648, %v2527_v26 }
 0x10a   : > { %v511_v31 = vadd.f32 %v510_v22, %v2421_v14  ;;  %v854_v37 = vsub.f32 1.0, %v853_v6  ;;  %v845_v41 = vsel %vm2644_vm10, %v2571_v33, %v841_v23  ;;  %v1307_v43 = vunpack.c.h.bf16 %v2454_v40 }
 0x10b   : > { %v1080_v17 = vmul.f32 %v2606_v61, %v1079_v19  ;;  %v2009_v59 = vpop.eup %2008  ;;  %vm847_vm11 = vcmp.eq.f32.partialorder %v846_v30, 8.507059e+37  ;;  %v849_v46 = vor.u32 1.1754944e-38, %v848_v9  ;;  %vm1083_vm12 = vweird.f32 %v2606_v61 }
 0x10c   : > { %v1086_v28 = vand.u32 2147483647, %v2560_v25  ;;  %v2657_v26 = vpop.eup %2010  ;;  %v2659_v44 = vadd.f32 1.0, %v2009_v59  ;;  %vm1082_vm13 = vweird.f32 %v2560_v25  ;;  %v1088_v40 = vand.u32 2147483648, %v2560_v25 }
 0x10d   : > { %v1081_v47 = vadd.f32 %v2606_v61, %v1080_v17  ;;  %v1093_v48 = vmul.f32 %v2657_v26, %v2621_v10  ;;  %v850_v36 = vsel %vm847_vm11, %v849_v46, %v845_v41  ;;  %v651_v49 = vmax.f32 %v511_v31, 0.0  ;;  %vm2668_vm14 = vmor %vm1082_vm13, %vm1083_vm12 }
 0x10e   : > { %v2664_v33 = vpop.eup %2012  ;;  %v608_v53 = vadd.f32 %v607_v39, %v2414_v1  ;;  %2016 = vrcp.f32 %v2659_v44  ;;  %v1275_v55 = vsub.f32 1.0, %v850_v36  ;;  %v1323_v57 = vunpack.c.h.bf16 %v2611_v62 }
 0x10f   : > { %v2015_v56 = vpop.eup %2014  ;;  %v1085_v25 = vsel %vm2668_vm14, %v2606_v61, %v1081_v47  ;;  %vm1087_vm15 = vcmp.eq.f32.partialorder %v1086_v28, 8.507059e+37  ;;  %v1089_v51 = vor.u32 1.1754944e-38, %v1088_v40  ;;  %v1094_v0 = vsub.f32 1.0, %v1093_v48 }
 0x110   : > { %v2678_v20 = vadd.f32 1.0, %v2015_v56  ;;  %v1735_v63 = vmul.f32 -1.442695, %v608_v53  ;;  %v2682_v27 = vmul.f32 %v2664_v33, %v2627_v13  ;;  %v1339_v58 = vmul.f32 %v1307_v43, %v1275_v55  ;;  %v572_v59 = vpop.f32.mrf.mxu1 }
 0x111   : > { %v570_v45 = vadd.f32 %v569_v54, %v2414_v1  ;;  %v1090_v2 = vsel %vm1087_vm15, %v1089_v51, %v1085_v25  ;;  %v855_v61 = vmul.f32 %v2624_v52, %v854_v37  ;;  %vm857_vm0 = vweird.f32 %v2586_v42 }
 0x112   : > { %2018 = vrcp.f32 %v2678_v20  ;;  %v1371_v62 = vadd.f32 %v1339_v58, %v635_v38  ;;  %v1291_v8 = vsub.f32 1.0, %v1090_v2  ;;  %v2689_v3 = vadd.f32 %v473_v60, %v2421_v14  ;;  %v513_v38 = vpop.f32.mrf.mxu2 }
 0x113   : > { %2020 = vpow2.f32 %v1735_v63  ;;  %v1720_v29 = vmul.f32 -1.442695, %v570_v45  ;;  %v856_v4 = vadd.f32 %v2624_v52, %v855_v61  ;;  %vm858_vm1 = vweird.f32 %v2624_v52 }
 0x114   : > { %v861_v5 = vand.u32 2147483647, %v2586_v42  ;;  %v2694_v34 = vpop.eup %2016  ;;  %v1792_v11 = vpack.c.bf16 %v1371_v62, %v2637_v32  ;;  %v1355_v12 = vmul.f32 %v1323_v57, %v1291_v8  ;;  %vm2697_vm2 = vmor %vm857_vm0, %vm858_vm1  ;;  %v863_v18 = vand.u32 2147483648, %v2586_v42  ;;  %v2751_v57 = vld [vmem:[%s2388_s30 + $0x50] sm:$0xff]  }
 0x115   : > { %2022 = vpow2.f32 %v1720_v29  ;;  %v869_v19 = vsub.f32 1.0, %v2682_v27  ;;  %v1386_v6 = vadd.f32 %v1354_v24, %v650_v16  ;;  %v860_v22 = vsel %vm2697_vm2, %v2624_v52, %v856_v4  ;;  %v609_v52 = vpop.f32.mrf.mxu3 }
 0x116   : > { %v1108_v32 = vmul.f32 %v2694_v34, %v2659_v44  ;;  %1864 = vst [vmem:[%s2599_s18 + $0x8] sm:$0xff] %v1792_v11   ;;  %v1387_v23 = vadd.f32 %v1355_v12, %v651_v49  ;;  %v864_v30 = vor.u32 1.1754944e-38, %v863_v18  ;;  %v1095_v42 = vmul.f32 %v2657_v26, %v1094_v0  ;;  %v475_v49 = vpop.f32.mrf.mxu0 }
 0x117   : > { %v636_v50 = vmax.f32 %v2689_v3, 0.0  ;;  %vm862_vm3 = vcmp.eq.f32.partialorder %v861_v5, 8.507059e+37  ;;  %v2719_v16 = vadd.f32 %v513_v38, %v2421_v14  ;;  %vm1098_vm4 = vweird.f32 %v2657_v26 }
 0x118   : > { %v2715_v35 = vpop.eup %2018  ;;  %v1832_v9 = vpack.c.bf16 %v1387_v23, %v1386_v6  ;;  %v865_v31 = vsel %vm862_vm3, %v864_v30, %v860_v22  ;;  %v1308_v37 = vunpack.c.l.bf16 %v2706_v21  ;;  %v1101_v41 = vand.u32 2147483647, %v2621_v10 }
 0x119   : > { %v2021_v24 = vpop.eup %2020  ;;  %v1276_v17 = vsub.f32 1.0, %v865_v31  ;;  %v1096_v39 = vadd.f32 %v2657_v26, %v1095_v42  ;;  %vm1097_vm5 = vweird.f32 %v2621_v10  ;;  %v1109_v28 = vsub.f32 1.0, %v1108_v32  ;;  %v574_v42 = vpop.f32.mrf.mxu1 }
 0x11a   : > { %v2724_v43 = vadd.f32 1.0, %v2021_v24  ;;  %v2730_v47 = vmul.f32 %v2715_v35, %v2678_v20  ;;  %1872 = vst [vmem:[%s2599_s18 + $0x48] sm:$0xff] %v1832_v9   ;;  %vm2735_vm6 = vmor %vm1097_vm5, %vm1098_vm4  ;;  %v1103_v48 = vand.u32 2147483648, %v2621_v10  ;;  %v610_v36 = vadd.f32 %v609_v52, %v2414_v1  ;;  %v515_v5 = vpop.f32.mrf.mxu2 }
 0x11b   : > { %v2023_v46 = vpop.eup %2022  ;;  %v652_v53 = vmax.f32 %v2719_v16, 0.0  ;;  %v1100_v54 = vsel %vm2735_vm6, %v2657_v26, %v1096_v39  ;;  %vm1102_vm7 = vcmp.eq.f32.partialorder %v1101_v41, 8.507059e+37  ;;  %v573_v25 = vadd.f32 %v572_v59, %v2414_v1 }
 0x11c   : > { %2024 = vrcp.f32 %v2724_v43  ;;  %v2742_v7 = vadd.f32 1.0, %v2023_v46  ;;  %v1104_v56 = vor.u32 1.1754944e-38, %v1103_v48  ;;  %v1736_v55 = vmul.f32 -1.442695, %v610_v36 }
 0x11d   : > { %v1340_v10 = vmul.f32 %v1308_v37, %v1276_v17  ;;  %v476_v51 = vadd.f32 %v475_v49, %v2421_v14  ;;  %v870_v63 = vmul.f32 %v2664_v33, %v869_v19  ;;  %v884_v0 = vsub.f32 1.0, %v2730_v47  ;;  %v612_v6 = vpop.f32.mrf.mxu3 }
 0x11e   : > { %2026 = vrcp.f32 %v2742_v7  ;;  %v1105_v27 = vsel %vm1102_vm7, %v1104_v56, %v1100_v54  ;;  %v1721_v58 = vmul.f32 -1.442695, %v573_v25  ;;  %vm872_vm8 = vweird.f32 %v2627_v13  ;;  %v478_v47 = vpop.f32.mrf.mxu0 }
 0x11f   : > { %2028 = vpow2.f32 %v1736_v55  ;;  %v871_v26 = vadd.f32 %v2664_v33, %v870_v63  ;;  %vm873_vm9 = vweird.f32 %v2664_v33  ;;  %v876_v45 = vand.u32 2147483647, %v2627_v13 }
 0x120   : > { %v1292_v60 = vsub.f32 1.0, %v1105_v27  ;;  %v1324_v2 = vunpack.c.l.bf16 %v2751_v57  ;;  %2030 = vpow2.f32 %v1721_v58  ;;  %vm2761_vm10 = vmor %vm872_vm8, %vm873_vm9  ;;  %v878_v62 = vand.u32 2147483648, %v2627_v13 }
 0x121   : > { %v1372_v29 = vadd.f32 %v1340_v10, %v636_v50  ;;  %v637_v3 = vmax.f32 %v476_v51, 0.0  ;;  %v875_v4 = vsel %vm2761_vm10, %v2664_v33, %v871_v26  ;;  %v1110_v11 = vmul.f32 %v2694_v34, %v1109_v28 }
 0x122   : > { %v2766_v8 = vpop.eup %2024  ;;  %vm877_vm11 = vcmp.eq.f32.partialorder %v876_v45, 8.507059e+37  ;;  %v879_v15 = vor.u32 1.1754944e-38, %v878_v62  ;;  %v1309_v18 = vunpack.c.h.bf16 %v2706_v21  ;;  %vm1112_vm12 = vweird.f32 %v2659_v44  ;;  %v2823_v45 = vld [vmem:[%s2388_s30 + $0x18] sm:$0xff]   ;;  %v518_v62 = vpop.f32.mrf.mxu2 }
 0x123   : > { %v1123_v12 = vmul.f32 %v2766_v8, %v2724_v43  ;;  %v1111_v13 = vadd.f32 %v2694_v34, %v1110_v11  ;;  %vm1113_vm13 = vweird.f32 %v2694_v34  ;;  %v1116_v33 = vand.u32 2147483647, %v2659_v44 }
 0x124   : > { %v2775_v19 = vpop.eup %2026  ;;  %v1356_v32 = vmul.f32 %v1324_v2, %v1292_v60  ;;  %v880_v23 = vsel %vm877_vm11, %v879_v15, %v875_v4  ;;  %v516_v30 = vadd.f32 %v515_v5, %v2421_v14  ;;  %vm2782_vm14 = vmor %vm1112_vm12, %vm1113_vm13  ;;  %v1118_v21 = vand.u32 2147483648, %v2659_v44 }
 0x125   : > { %v2029_v22 = vpop.eup %2028  ;;  %v1124_v50 = vsub.f32 1.0, %v1123_v12  ;;  %v1277_v24 = vsub.f32 1.0, %v880_v23  ;;  %v1115_v9 = vsel %vm2782_vm14, %v2694_v34, %v1111_v13  ;;  %vm1117_vm15 = vcmp.eq.f32.partialorder %v1116_v33, 8.507059e+37  ;;  %v577_v13 = vpop.f32.mrf.mxu1 }
 0x126   : > { %v2787_v52 = vadd.f32 1.0, %v2029_v22  ;;  %v2031_v31 = vpop.eup %2030  ;;  %v1119_v37 = vor.u32 1.1754944e-38, %v1118_v21  ;;  %v1325_v41 = vunpack.c.h.bf16 %v2751_v57  ;;  %v613_v17 = vadd.f32 %v612_v6, %v2414_v1 }
 0x127   : > { %v2795_v39 = vadd.f32 1.0, %v2031_v31  ;;  %v1341_v44 = vmul.f32 %v1309_v18, %v1277_v24  ;;  %v575_v59 = vadd.f32 %v574_v42, %v2414_v1  ;;  %v2800_v46 = vmul.f32 %v2775_v19, %v2742_v7  ;;  %v614_v18 = vpop.f32.mrf.mxu3 }
 0x128   : > { %2032 = vrcp.f32 %v2787_v52  ;;  %v1120_v28 = vsel %vm1117_vm15, %v1119_v37, %v1115_v9  ;;  %v1737_v34 = vmul.f32 -1.442695, %v613_v17  ;;  %v885_v40 = vmul.f32 %v2715_v35, %v884_v0 }
 0x129   : > { %2034 = vrcp.f32 %v2795_v39  ;;  %v1373_v48 = vadd.f32 %v1341_v44, %v637_v3  ;;  %v1293_v36 = vsub.f32 1.0, %v1120_v28  ;;  %v1722_v49 = vmul.f32 -1.442695, %v575_v59 }
 0x12a   : > { %v653_v54 = vmax.f32 %v516_v30, 0.0  ;;  %2036 = vpow2.f32 %v1737_v34  ;;  %v886_v56 = vadd.f32 %v2715_v35, %v885_v40  ;;  %vm887_vm0 = vweird.f32 %v2678_v20 }
 0x12b   : > { %v1797_v55 = vpack.c.bf16 %v1373_v48, %v1372_v29  ;;  %v1357_v25 = vmul.f32 %v1325_v41, %v1293_v36  ;;  %2038 = vpow2.f32 %v1722_v49  ;;  %vm888_vm1 = vweird.f32 %v2715_v35 }
 0x12c   : > { %v1388_v10 = vadd.f32 %v1356_v32, %v652_v53  ;;  %v2810_v57 = vadd.f32 %v478_v47, %v2421_v14  ;;  %vm2812_vm2 = vmor %vm887_vm0, %vm888_vm1  ;;  %v891_v63 = vand.u32 2147483647, %v2678_v20  ;;  %v893_v0 = vand.u32 2147483648, %v2678_v20  ;;  %v2848_v32 = vld [vmem:[%s2388_s30 + $0x58] sm:$0xff]  }
 0x12d   : > { %v899_v58 = vsub.f32 1.0, %v2800_v46  ;;  %1865 = vst [vmem:[%s2599_s18 + $0x10] sm:$0xff] %v1797_v55   ;;  %v1389_v26 = vadd.f32 %v1357_v25, %v653_v54  ;;  %v890_v16 = vsel %vm2812_vm2, %v2715_v35, %v886_v56  ;;  %v1125_v53 = vmul.f32 %v2766_v8, %v1124_v50  ;;  %v480_v50 = vpop.f32.mrf.mxu0 }
 0x12e   : > { %v2818_v27 = vpop.eup %2032  ;;  %vm892_vm3 = vcmp.eq.f32.partialorder %v891_v63, 8.507059e+37  ;;  %v894_v2 = vor.u32 1.1754944e-38, %v893_v0  ;;  %vm1127_vm4 = vweird.f32 %v2724_v43  ;;  %vm1128_vm5 = vweird.f32 %v2766_v8 }
 0x12f   : > { %v1138_v60 = vmul.f32 %v2818_v27, %v2787_v52  ;;  %v2832_v20 = vpop.eup %2034  ;;  %v1837_v61 = vpack.c.bf16 %v1389_v26, %v1388_v10  ;;  %v1126_v29 = vadd.f32 %v2766_v8, %v1125_v53  ;;  %v1131_v35 = vand.u32 2147483647, %v2724_v43  ;;  %vm2839_vm6 = vmor %vm1127_vm4, %vm1128_vm5  ;;  %v617_v0 = vpop.f32.mrf.mxu3 }
 0x130   : > { %v2037_v3 = vpop.eup %2036  ;;  %v638_v4 = vmax.f32 %v2810_v57, 0.0  ;;  %v895_v5 = vsel %vm892_vm3, %v894_v2, %v890_v16  ;;  %v1310_v11 = vunpack.c.l.bf16 %v2823_v45  ;;  %v1133_v15 = vand.u32 2147483648, %v2724_v43  ;;  %v520_v57 = vpop.f32.mrf.mxu2 }
 0x131   : > { %v2039_v33 = vpop.eup %2038  ;;  %1873 = vst [vmem:[%s2599_s18 + $0x50] sm:$0xff] %v1837_v61   ;;  %v2845_v6 = vadd.f32 1.0, %v2037_v3  ;;  %v1278_v22 = vsub.f32 1.0, %v895_v5  ;;  %v519_v23 = vadd.f32 %v518_v62, %v2421_v14  ;;  %v1130_v30 = vsel %vm2839_vm6, %v2766_v8, %v1126_v29  ;;  %v579_v16 = vpop.f32.mrf.mxu1 }
 0x132   : > { %v1139_v38 = vsub.f32 1.0, %v1138_v60  ;;  %v2856_v21 = vmul.f32 %v2832_v20, %v2795_v39  ;;  %v2858_v43 = vadd.f32 1.0, %v2039_v33  ;;  %v1134_v42 = vor.u32 1.1754944e-38, %v1133_v15 }
 0x133   : > { %2040 = vrcp.f32 %v2845_v6  ;;  %vm1132_vm7 = vcmp.eq.f32.partialorder %v1131_v35, 8.507059e+37  ;;  %v615_v24 = vadd.f32 %v614_v18, %v2414_v1  ;;  %v578_v9 = vadd.f32 %v577_v13, %v2414_v1 }
 0x134   : > { %v1342_v31 = vmul.f32 %v1310_v11, %v1278_v22  ;;  %v1135_v37 = vsel %vm1132_vm7, %v1134_v42, %v1130_v30  ;;  %v1326_v8 = vunpack.c.l.bf16 %v2848_v32  ;;  %v900_v41 = vmul.f32 %v2775_v19, %v899_v58 }
 0x135   : > { %v1294_v17 = vsub.f32 1.0, %v1135_v37  ;;  %v1738_v44 = vmul.f32 -1.442695, %v615_v24  ;;  %v1723_v59 = vmul.f32 -1.442695, %v578_v9  ;;  %v481_v46 = vadd.f32 %v480_v50, %v2421_v14  ;;  %v483_v30 = vpop.f32.mrf.mxu0 }
 0x136   : > { %2042 = vrcp.f32 %v2858_v43  ;;  %v901_v28 = vadd.f32 %v2775_v19, %v900_v41  ;;  %vm902_vm8 = vweird.f32 %v2742_v7  ;;  %vm903_vm9 = vweird.f32 %v2775_v19 }
 0x137   : > { %v654_v34 = vmax.f32 %v519_v23, 0.0  ;;  %2044 = vpow2.f32 %v1738_v44  ;;  %vm2870_vm10 = vmor %vm902_vm8, %vm903_vm9  ;;  %v906_v40 = vand.u32 2147483647, %v2742_v7  ;;  %v908_v48 = vand.u32 2147483648, %v2742_v7 }
 0x138   : > { %v914_v36 = vsub.f32 1.0, %v2856_v21  ;;  %v1358_v49 = vmul.f32 %v1326_v8, %v1294_v17  ;;  %2046 = vpow2.f32 %v1723_v59  ;;  %v905_v54 = vsel %vm2870_vm10, %v2775_v19, %v901_v28  ;;  %v523_v8 = vpop.f32.mrf.mxu2  ;;  %v2931_v28 = vld [vmem:[%s2388_s30 + $0x20] sm:$0xff]  }
 0x139   : > { %v2880_v56 = vpop.eup %2040  ;;  %v1374_v55 = vadd.f32 %v1342_v31, %v638_v4  ;;  %v639_v25 = vmax.f32 %v481_v46, 0.0  ;;  %v909_v10 = vor.u32 1.1754944e-38, %v908_v48  ;;  %v1140_v51 = vmul.f32 %v2818_v27, %v1139_v38 }
 0x13a   : > { %v1153_v63 = vmul.f32 %v2880_v56, %v2845_v6  ;;  %vm907_vm11 = vcmp.eq.f32.partialorder %v906_v40, 8.507059e+37  ;;  %v1311_v7 = vunpack.c.h.bf16 %v2823_v45  ;;  %vm1143_vm12 = vweird.f32 %v2818_v27 }
 0x13b   : > { %v910_v58 = vsel %vm907_vm11, %v909_v10, %v905_v54  ;;  %v1141_v19 = vadd.f32 %v2818_v27, %v1140_v51  ;;  %vm1142_vm13 = vweird.f32 %v2787_v52  ;;  %v1146_v26 = vand.u32 2147483647, %v2787_v52  ;;  %v619_v10 = vpop.f32.mrf.mxu3 }
 0x13c   : > { %v2890_v53 = vpop.eup %2042  ;;  %v2892_v60 = vadd.f32 %v1358_v49, %v654_v34  ;;  %v1279_v2 = vsub.f32 1.0, %v910_v58  ;;  %v521_v61 = vadd.f32 %v520_v57, %v2421_v14  ;;  %vm2895_vm14 = vmor %vm1142_vm13, %vm1143_vm12  ;;  %v1148_v62 = vand.u32 2147483648, %v2787_v52  ;;  %v582_v58 = vpop.f32.mrf.mxu1 }
 0x13d   : > { %v2045_v29 = vpop.eup %2044  ;;  %v1154_v35 = vsub.f32 1.0, %v1153_v63  ;;  %v1145_v3 = vsel %vm2895_vm14, %v2818_v27, %v1141_v19  ;;  %v1327_v4 = vunpack.c.h.bf16 %v2848_v32  ;;  %v618_v5 = vadd.f32 %v617_v0, %v2414_v1 }
 0x13e   : > { %v2047_v11 = vpop.eup %2046  ;;  %v2905_v12 = vadd.f32 1.0, %v2045_v29  ;;  %v1343_v15 = vmul.f32 %v1311_v7, %v1279_v2  ;;  %v1149_v18 = vor.u32 1.1754944e-38, %v1148_v62  ;;  %v580_v13 = vadd.f32 %v579_v16, %v2414_v1  ;;  %v485_v29 = vpop.f32.mrf.mxu0 }
 0x13f   : > { %v2908_v33 = vadd.f32 1.0, %v2047_v11  ;;  %vm1147_vm15 = vcmp.eq.f32.partialorder %v1146_v26, 8.507059e+37  ;;  %v1739_v52 = vmul.f32 -1.442695, %v618_v5  ;;  %v915_v22 = vmul.f32 %v2832_v20, %v914_v36 }
 0x140   : > { %2048 = vrcp.f32 %v2905_v12  ;;  %v1375_v27 = vadd.f32 %v1343_v15, %v639_v25  ;;  %v1150_v23 = vsel %vm1147_vm15, %v1149_v18, %v1145_v3  ;;  %v1724_v32 = vmul.f32 -1.442695, %v580_v13 }
 0x141   : > { %2050 = vrcp.f32 %v2908_v33  ;;  %v655_v38 = vmax.f32 %v521_v61, 0.0  ;;  %v1295_v21 = vsub.f32 1.0, %v1150_v23  ;;  %v916_v42 = vadd.f32 %v2832_v20, %v915_v22  ;;  %v525_v22 = vpop.f32.mrf.mxu2 }
 0x142   : > { %v1802_v50 = vpack.c.bf16 %v1375_v27, %v1374_v55  ;;  %2052 = vpow2.f32 %v1739_v52  ;;  %vm917_vm0 = vweird.f32 %v2795_v39  ;;  %vm918_vm1 = vweird.f32 %v2832_v20 }
 0x143   : > { %v1359_v24 = vmul.f32 %v1327_v4, %v1295_v21  ;;  %2054 = vpow2.f32 %v1724_v32  ;;  %vm2916_vm2 = vmor %vm917_vm0, %vm918_vm1  ;;  %v921_v31 = vand.u32 2147483647, %v2795_v39  ;;  %v923_v37 = vand.u32 2147483648, %v2795_v39  ;;  %v3054_v21 = vld [vmem:[%s2388_s30 + $0x68] sm:$0xff]  }
 0x144   : > { %v928_v41 = vmul.f32 %v2890_v53, %v2858_v43  ;;  %1866 = vst [vmem:[%s2599_s18 + $0x18] sm:$0xff] %v1802_v50   ;;  %v484_v17 = vadd.f32 %v483_v30, %v2421_v14  ;;  %v920_v44 = vsel %vm2916_vm2, %v2832_v20, %v916_v42  ;;  %v1155_v59 = vmul.f32 %v2880_v56, %v1154_v35 }
 0x145   : > { %v1391_v46 = vadd.f32 %v1359_v24, %v655_v38  ;;  %vm922_vm3 = vcmp.eq.f32.partialorder %v921_v31, 8.507059e+37  ;;  %v924_v34 = vor.u32 1.1754944e-38, %v923_v37  ;;  %v2934_v39 = vadd.f32 %v523_v8, %v2421_v14 }
 0x146   : > { %v2936_v47 = vpop.eup %2048  ;;  %v1156_v40 = vadd.f32 %v2880_v56, %v1155_v59  ;;  %vm1157_vm4 = vweird.f32 %v2845_v6  ;;  %vm1158_vm5 = vweird.f32 %v2880_v56  ;;  %v1161_v20 = vand.u32 2147483647, %v2845_v6 }
 0x147   : > { %v2942_v48 = vpop.eup %2050  ;;  %v1168_v36 = vmul.f32 %v2936_v47, %v2905_v12  ;;  %v1842_v49 = vpack.c.bf16 %v1391_v46, %v2892_v60  ;;  %v925_v54 = vsel %vm922_vm3, %v924_v34, %v920_v44  ;;  %vm2947_vm6 = vmor %vm1157_vm4, %vm1158_vm5  ;;  %v1163_v25 = vand.u32 2147483648, %v2845_v6  ;;  %v2964_v60 = vld [vmem:[%s2388_s30 + $0x60] sm:$0xff]  }
 0x148   : > { %v2053_v57 = vpop.eup %2052  ;;  %v2954_v51 = vmul.f32 %v2942_v48, %v2908_v33  ;;  %v1280_v63 = vsub.f32 1.0, %v925_v54  ;;  %v1312_v7 = vunpack.c.l.bf16 %v2931_v28  ;;  %v1160_v0 = vsel %vm2947_vm6, %v2880_v56, %v1156_v40  ;;  %v584_v40 = vpop.f32.mrf.mxu1 }
 0x149   : > { %v2055_v19 = vpop.eup %2054  ;;  %v929_v26 = vsub.f32 1.0, %v928_v41  ;;  %1874 = vst [vmem:[%s2599_s18 + $0x58] sm:$0xff] %v1842_v49   ;;  %v2961_v16 = vadd.f32 1.0, %v2053_v57  ;;  %v640_v6 = vmax.f32 %v484_v17, 0.0  ;;  %v1164_v2 = vor.u32 1.1754944e-38, %v1163_v25  ;;  %v622_v17 = vpop.f32.mrf.mxu3 }
 0x14a   : > { %v2966_v61 = vadd.f32 1.0, %v2055_v19  ;;  %v656_v45 = vmax.f32 %v2934_v39, 0.0  ;;  %vm1162_vm7 = vcmp.eq.f32.partialorder %v1161_v20, 8.507059e+37  ;;  %v620_v62 = vadd.f32 %v619_v10, %v2414_v1  ;;  %v488_v19 = vpop.f32.mrf.mxu0 }
 0x14b   : > { %v1169_v35 = vsub.f32 1.0, %v1168_v36  ;;  %2056 = vrcp.f32 %v2961_v16  ;;  %v1165_v56 = vsel %vm1162_vm7, %v1164_v2, %v1160_v0  ;;  %v583_v3 = vadd.f32 %v582_v58, %v2414_v1 }
 0x14c   : > { %v944_v4 = vsub.f32 1.0, %v2954_v51  ;;  %v1344_v5 = vmul.f32 %v1312_v7, %v1280_v63  ;;  %v1328_v11 = vunpack.c.l.bf16 %v2964_v60  ;;  %v1740_v15 = vmul.f32 -1.442695, %v620_v62 }
 0x14d   : > { %2058 = vrcp.f32 %v2966_v61  ;;  %v1725_v18 = vmul.f32 -1.442695, %v583_v3  ;;  %v486_v13 = vadd.f32 %v485_v29, %v2421_v14  ;;  %v930_v52 = vmul.f32 %v2890_v53, %v929_v26  ;;  %v3025_v3 = vld [vmem:[%s2388_s30 + $0x28] sm:$0xff]  }
 0x14e   : > { %v1296_v27 = vsub.f32 1.0, %v1165_v56  ;;  %2060 = vpow2.f32 %v1740_v15  ;;  %vm933_vm8 = vweird.f32 %v2890_v53  ;;  %v936_v23 = vand.u32 2147483647, %v2858_v43 }
 0x14f   : > { %2062 = vpow2.f32 %v1725_v18  ;;  %v931_v32 = vadd.f32 %v2890_v53, %v930_v52  ;;  %vm932_vm9 = vweird.f32 %v2858_v43  ;;  %v938_v30 = vand.u32 2147483648, %v2858_v43 }
 0x150   : > { %v1376_v38 = vadd.f32 %v1344_v5, %v640_v6  ;;  %vm2982_vm10 = vmor %vm932_vm9, %vm933_vm8  ;;  %v1313_v42 = vunpack.c.h.bf16 %v2931_v28  ;;  %v526_v50 = vadd.f32 %v525_v22, %v2421_v14  ;;  %v1170_v24 = vmul.f32 %v2936_v47, %v1169_v35 }
 0x151   : > { %v2989_v9 = vpop.eup %2056  ;;  %v935_v31 = vsel %vm2982_vm10, %v2890_v53, %v931_v32  ;;  %vm937_vm11 = vcmp.eq.f32.partialorder %v936_v23, 8.507059e+37  ;;  %v939_v37 = vor.u32 1.1754944e-38, %v938_v30  ;;  %vm1173_vm12 = vweird.f32 %v2936_v47 }
 0x152   : > { %v1183_v43 = vmul.f32 %v2989_v9, %v2961_v16  ;;  %v1171_v8 = vadd.f32 %v2936_v47, %v1170_v24  ;;  %vm1172_vm13 = vweird.f32 %v2905_v12  ;;  %v1176_v41 = vand.u32 2147483647, %v2905_v12 }
 0x153   : > { %v3000_v44 = vpop.eup %2058  ;;  %v1360_v59 = vmul.f32 %v1328_v11, %v1296_v27  ;;  %v641_v46 = vmax.f32 %v486_v13, 0.0  ;;  %v940_v28 = vsel %vm937_vm11, %v939_v37, %v935_v31  ;;  %vm3002_vm14 = vmor %vm1172_vm13, %vm1173_vm12  ;;  %v1178_v34 = vand.u32 2147483648, %v2905_v12 }
 0x154   : > { %v2061_v20 = vpop.eup %2060  ;;  %v1281_v36 = vsub.f32 1.0, %v940_v28  ;;  %v657_v49 = vmax.f32 %v526_v50, 0.0  ;;  %v1175_v54 = vsel %vm3002_vm14, %v2936_v47, %v1171_v8  ;;  %v1329_v55 = vunpack.c.h.bf16 %v2964_v60  ;;  %v587_v8 = vpop.f32.mrf.mxu1 }
 0x155   : > { %v2063_v25 = vpop.eup %2062  ;;  %v1184_v10 = vsub.f32 1.0, %v1183_v43  ;;  %v3011_v57 = vadd.f32 1.0, %v2061_v20  ;;  %v1179_v51 = vor.u32 1.1754944e-38, %v1178_v34  ;;  %v623_v63 = vadd.f32 %v622_v17, %v2414_v1  ;;  %v624_v43 = vpop.f32.mrf.mxu3 }
 0x156   : > { %v3014_v7 = vadd.f32 1.0, %v2063_v25  ;;  %v1345_v12 = vmul.f32 %v1313_v42, %v1281_v36  ;;  %vm1177_vm15 = vcmp.eq.f32.partialorder %v1176_v41, 8.507059e+37  ;;  %v585_v0 = vadd.f32 %v584_v40, %v2414_v1  ;;  %v490_v20 = vpop.f32.mrf.mxu0 }
 0x157   : > { %2064 = vrcp.f32 %v3011_v57  ;;  %v1180_v58 = vsel %vm1177_vm15, %v1179_v51, %v1175_v54  ;;  %v1741_v47 = vmul.f32 -1.442695, %v623_v63  ;;  %v945_v26 = vmul.f32 %v2942_v48, %v944_v4  ;;  %v528_v4 = vpop.f32.mrf.mxu2 }
 0x158   : > { %2066 = vrcp.f32 %v3014_v7  ;;  %v1377_v6 = vadd.f32 %v1345_v12, %v641_v46  ;;  %v1297_v60 = vsub.f32 1.0, %v1180_v58  ;;  %v1726_v2 = vmul.f32 -1.442695, %v585_v0 }
 0x159   : > { %v958_v62 = vmul.f32 %v3000_v44, %v2966_v61  ;;  %2068 = vpow2.f32 %v1741_v47  ;;  %v946_v29 = vadd.f32 %v2942_v48, %v945_v26  ;;  %vm947_vm0 = vweird.f32 %v2908_v33 }
 0x15a   : > { %v1807_v35 = vpack.c.bf16 %v1377_v6, %v1376_v38  ;;  %v1361_v56 = vmul.f32 %v1329_v55, %v1297_v60  ;;  %2070 = vpow2.f32 %v1726_v2  ;;  %vm948_vm1 = vweird.f32 %v2942_v48 }
 0x15b   : > { %v1392_v5 = vadd.f32 %v1360_v59, %v656_v45  ;;  %v3031_v11 = vadd.f32 %v488_v19, %v2421_v14  ;;  %vm3033_vm2 = vmor %vm947_vm0, %vm948_vm1  ;;  %v951_v18 = vand.u32 2147483647, %v2908_v33  ;;  %v953_v13 = vand.u32 2147483648, %v2908_v33 }
 0x15c   : > { %1867 = vst [vmem:[%s2599_s18 + $0x20] sm:$0xff] %v1807_v35   ;;  %v1393_v52 = vadd.f32 %v1361_v56, %v657_v49  ;;  %v950_v22 = vsel %vm3033_vm2, %v2942_v48, %v946_v29  ;;  %v3044_v39 = vadd.f32 %v528_v4, %v2421_v14  ;;  %v1185_v45 = vmul.f32 %v2989_v9, %v1184_v10 }
 0x15d   : > { %v3047_v27 = vpop.eup %2064  ;;  %v959_v23 = vsub.f32 1.0, %v958_v62  ;;  %v954_v32 = vor.u32 1.1754944e-38, %v953_v13  ;;  %v1314_v30 = vunpack.c.l.bf16 %v3025_v3  ;;  %vm1188_vm3 = vweird.f32 %v2989_v9  ;;  %v627_v15 = vpop.f32.mrf.mxu3 }
 0x15e   : > { %v3051_v33 = vpop.eup %2066  ;;  %v1847_v38 = vpack.c.bf16 %v1393_v52, %v1392_v5  ;;  %vm952_vm4 = vcmp.eq.f32.partialorder %v951_v18, 8.507059e+37  ;;  %v1186_v48 = vadd.f32 %v2989_v9, %v1185_v45  ;;  %vm1187_vm5 = vweird.f32 %v2961_v16  ;;  %v589_v52 = vpop.f32.mrf.mxu1 }
 0x15f   : > { %v2069_v42 = vpop.eup %2068  ;;  %v1198_v50 = vmul.f32 %v3047_v27, %v3011_v57  ;;  %v955_v24 = vsel %vm952_vm4, %v954_v32, %v950_v22  ;;  %v1191_v31 = vand.u32 2147483647, %v2961_v16  ;;  %v1193_v37 = vand.u32 2147483648, %v2961_v16  ;;  %vm1189_vm6 = vmor %vm1187_vm5, %vm1188_vm3  ;;  %v530_v0 = vpop.f32.mrf.mxu2 }
 0x160   : > { %v2071_v41 = vpop.eup %2070  ;;  %1875 = vst [vmem:[%s2599_s18 + $0x60] sm:$0xff] %v1847_v38   ;;  %v3063_v17 = vadd.f32 1.0, %v2069_v42  ;;  %v642_v59 = vmax.f32 %v3031_v11, 0.0  ;;  %v1282_v46 = vsub.f32 1.0, %v955_v24  ;;  %v658_v28 = vmax.f32 %v3044_v39, 0.0 }
 0x161   : > { %v3071_v53 = vmul.f32 %v3051_v33, %v3014_v7  ;;  %v3073_v34 = vadd.f32 1.0, %v2071_v41  ;;  %v1190_v16 = vsel %vm1189_vm6, %v2989_v9, %v1186_v48  ;;  %v1330_v40 = vunpack.c.l.bf16 %v3054_v21 }
 0x162   : > { %2072 = vrcp.f32 %v3063_v17  ;;  %v1194_v36 = vor.u32 1.1754944e-38, %v1193_v37  ;;  %v625_v49 = vadd.f32 %v624_v43, %v2414_v1  ;;  %v588_v54 = vadd.f32 %v587_v8, %v2414_v1 }
 0x163   : > { %v1199_v55 = vsub.f32 1.0, %v1198_v50  ;;  %v1346_v25 = vmul.f32 %v1314_v30, %v1282_v46  ;;  %vm1192_vm7 = vcmp.eq.f32.partialorder %v1191_v31, 8.507059e+37  ;;  %v960_v10 = vmul.f32 %v3000_v44, %v959_v23 }
 0x164   : > { %v1195_v51 = vsel %vm1192_vm7, %v1194_v36, %v1190_v16  ;;  %v1742_v63 = vmul.f32 -1.442695, %v625_v49  ;;  %v1727_v12 = vmul.f32 -1.442695, %v588_v54  ;;  %v491_v9 = vadd.f32 %v490_v20, %v2421_v14  ;;  %v493_v20 = vpop.f32.mrf.mxu0 }
 0x165   : > { %2074 = vrcp.f32 %v3073_v34  ;;  %v961_v58 = vadd.f32 %v3000_v44, %v960_v10  ;;  %vm962_vm8 = vweird.f32 %v2966_v61  ;;  %vm963_vm9 = vweird.f32 %v3000_v44 }
 0x166   : > { %v974_v47 = vsub.f32 1.0, %v3071_v53  ;;  %2076 = vpow2.f32 %v1742_v63  ;;  %vm3087_vm10 = vmor %vm962_vm8, %vm963_vm9  ;;  %v966_v26 = vand.u32 2147483647, %v2966_v61  ;;  %v968_v6 = vand.u32 2147483648, %v2966_v61 }
 0x167   : > { %v1298_v60 = vsub.f32 1.0, %v1195_v51  ;;  %2078 = vpow2.f32 %v1727_v12  ;;  %v965_v2 = vsel %vm3087_vm10, %v3000_v44, %v961_v58  ;;  %v531_v62 = vadd.f32 %v530_v0, %v2421_v14  ;;  %v533_v12 = vpop.f32.mrf.mxu2  ;;  %v3146_v58 = vld [vmem:[%s2388_s30 + $0x30] sm:$0xff]  }
 0x168   : > { %v3097_v29 = vpop.eup %2072  ;;  %v1378_v35 = vadd.f32 %v1346_v25, %v642_v59  ;;  %v643_v56 = vmax.f32 %v491_v9, 0.0  ;;  %v969_v4 = vor.u32 1.1754944e-38, %v968_v6  ;;  %v1200_v5 = vmul.f32 %v3047_v27, %v1199_v55 }
 0x169   : > { %v1213_v11 = vmul.f32 %v3097_v29, %v3063_v17  ;;  %vm967_vm11 = vcmp.eq.f32.partialorder %v966_v26, 8.507059e+37  ;;  %v1315_v61 = vunpack.c.h.bf16 %v3025_v3  ;;  %vm1203_vm12 = vweird.f32 %v3047_v27 }
 0x16a   : > { %v970_v18 = vsel %vm967_vm11, %v969_v4, %v965_v2  ;;  %v1201_v44 = vadd.f32 %v3047_v27, %v1200_v5  ;;  %vm1202_vm13 = vweird.f32 %v3011_v57  ;;  %v1206_v13 = vand.u32 2147483647, %v3011_v57 }
 0x16b   : > { %v3107_v22 = vpop.eup %2074  ;;  %v1362_v45 = vmul.f32 %v1330_v40, %v1298_v60  ;;  %v1283_v23 = vsub.f32 1.0, %v970_v18  ;;  %v659_v32 = vmax.f32 %v531_v62, 0.0  ;;  %vm3109_vm14 = vmor %vm1202_vm13, %vm1203_vm12  ;;  %v1208_v3 = vand.u32 2147483648, %v3011_v57 }
 0x16c   : > { %v2077_v38 = vpop.eup %2076  ;;  %v1214_v48 = vsub.f32 1.0, %v1213_v11  ;;  %v1205_v42 = vsel %vm3109_vm14, %v3047_v27, %v1201_v44  ;;  %v1331_v50 = vunpack.c.h.bf16 %v3054_v21  ;;  %v628_v24 = vadd.f32 %v627_v15, %v2414_v1 }
 0x16d   : > { %v2079_v31 = vpop.eup %2078  ;;  %v3119_v37 = vadd.f32 1.0, %v2077_v38  ;;  %v1347_v43 = vmul.f32 %v1315_v61, %v1283_v23  ;;  %v1209_v8 = vor.u32 1.1754944e-38, %v1208_v3  ;;  %v590_v41 = vadd.f32 %v589_v52, %v2414_v1  ;;  %v3179_v23 = vld [vmem:[%s2388_s30 + $0x70] sm:$0xff]   ;;  %v495_v38 = vpop.f32.mrf.mxu0 }
 0x16e   : > { %v3122_v59 = vadd.f32 1.0, %v2079_v31  ;;  %vm1207_vm15 = vcmp.eq.f32.partialorder %v1206_v13, 8.507059e+37  ;;  %v1743_v57 = vmul.f32 -1.442695, %v628_v24  ;;  %v975_v46 = vmul.f32 %v3051_v33, %v974_v47 }
 0x16f   : > { %2080 = vrcp.f32 %v3119_v37  ;;  %v1379_v27 = vadd.f32 %v1347_v43, %v643_v56  ;;  %v1210_v53 = vsel %vm1207_vm15, %v1209_v8, %v1205_v42  ;;  %v1728_v21 = vmul.f32 -1.442695, %v590_v41 }
 0x170   : > { %v988_v16 = vmul.f32 %v3107_v22, %v3073_v34  ;;  %2082 = vrcp.f32 %v3122_v59  ;;  %v1299_v40 = vsub.f32 1.0, %v1210_v53  ;;  %v976_v36 = vadd.f32 %v3051_v33, %v975_v46  ;;  %v535_v53 = vpop.f32.mrf.mxu2 }
 0x171   : > { %v1812_v49 = vpack.c.bf16 %v1379_v27, %v1378_v35  ;;  %2084 = vpow2.f32 %v1743_v57  ;;  %vm977_vm0 = vweird.f32 %v3014_v7  ;;  %vm978_vm1 = vweird.f32 %v3051_v33  ;;  %v629_v35 = vpop.f32.mrf.mxu3 }
 0x172   : > { %v1363_v54 = vmul.f32 %v1331_v50, %v1299_v40  ;;  %2086 = vpow2.f32 %v1728_v21  ;;  %vm3132_vm2 = vmor %vm977_vm0, %vm978_vm1  ;;  %v981_v25 = vand.u32 2147483647, %v3014_v7  ;;  %v983_v10 = vand.u32 2147483648, %v3014_v7 }
 0x173   : > { %v1394_v51 = vadd.f32 %v1362_v45, %v658_v28  ;;  %1868 = vst [vmem:[%s2599_s18 + $0x28] sm:$0xff] %v1812_v49   ;;  %v980_v63 = vsel %vm3132_vm2, %v3051_v33, %v976_v36  ;;  %v1215_v9 = vmul.f32 %v3097_v29, %v1214_v48  ;;  %v494_v47 = vadd.f32 %v493_v20, %v2421_v14 }
 0x174   : > { %v1395_v0 = vadd.f32 %v1363_v54, %v659_v32  ;;  %v984_v19 = vor.u32 1.1754944e-38, %v983_v10  ;;  %v3150_v26 = vadd.f32 %v533_v12, %v2421_v14  ;;  %v989_v39 = vsub.f32 1.0, %v988_v16 }
 0x175   : > { %v3152_v7 = vpop.eup %2080  ;;  %vm982_vm3 = vcmp.eq.f32.partialorder %v981_v25, 8.507059e+37  ;;  %v1216_v28 = vadd.f32 %v3097_v29, %v1215_v9  ;;  %vm1218_vm4 = vweird.f32 %v3097_v29  ;;  %v1221_v62 = vand.u32 2147483647, %v3063_v17 }
 0x176   : > { %v3156_v33 = vpop.eup %2082  ;;  %v1228_v6 = vmul.f32 %v3152_v7, %v3119_v37  ;;  %v1852_v60 = vpack.c.bf16 %v1395_v0, %v1394_v51  ;;  %v985_v2 = vsel %vm982_vm3, %v984_v19, %v980_v63  ;;  %v1316_v5 = vunpack.c.l.bf16 %v3146_v58 }
 0x177   : > { %v2085_v56 = vpop.eup %2084  ;;  %v1284_v4 = vsub.f32 1.0, %v985_v2  ;;  %vm1217_vm5 = vweird.f32 %v3063_v17  ;;  %v1223_v11 = vand.u32 2147483648, %v3063_v17  ;;  %v644_v18 = vmax.f32 %v494_v47, 0.0  ;;  %v498_v2 = vpop.f32.mrf.mxu0 }
 0x178   : > { %v2087_v61 = vpop.eup %2086  ;;  %1876 = vst [vmem:[%s2599_s18 + $0x68] sm:$0xff] %v1852_v60   ;;  %v3165_v15 = vadd.f32 1.0, %v2085_v56  ;;  %v660_v44 = vmax.f32 %v3150_v26, 0.0  ;;  %vm3170_vm6 = vmor %vm1217_vm5, %vm1218_vm4  ;;  %v1003_v52 = vmul.f32 %v3156_v33, %v3122_v59  ;;  %v630_v32 = vadd.f32 %v629_v35, %v2414_v1 }
 0x179   : > { %v3176_v45 = vadd.f32 1.0, %v2087_v61  ;;  %v1220_v17 = vsel %vm3170_vm6, %v3097_v29, %v1216_v28  ;;  %v1229_v30 = vsub.f32 1.0, %v1228_v6  ;;  %vm3186_vm7 = vcmp.eq.f32.partialorder %v1221_v62, 8.507059e+37 }
 0x17a   : > { %2088 = vrcp.f32 %v3165_v15  ;;  %v990_v48 = vmul.f32 %v3107_v22, %v989_v39  ;;  %v1348_v42 = vmul.f32 %v1316_v5, %v1284_v4  ;;  %v1224_v50 = vor.u32 1.1754944e-38, %v1223_v11 }
 0x17b   : > { %2090 = vrcp.f32 %v3176_v45  ;;  %v1744_v24 = vmul.f32 -1.442695, %v630_v32  ;;  %v1332_v31 = vunpack.c.l.bf16 %v3179_v23  ;;  %vm992_vm8 = vweird.f32 %v3073_v34 }
 0x17c   : > { %v991_v29 = vadd.f32 %v3107_v22, %v990_v48  ;;  %vm993_vm9 = vweird.f32 %v3107_v22  ;;  %v1004_v1 = vsub.f32 1.0, %v1003_v52  ;;  %v996_v8 = vand.u32 2147483647, %v3073_v34 }
 0x17d   : > { %2092 = vpow2.f32 %v1744_v24  ;;  %vm3196_vm10 = vmor %vm992_vm8, %vm993_vm9  ;;  %v998_v41 = vand.u32 2147483648, %v3073_v34  ;;  %v1225_v57 = vsel %vm3186_vm7, %v1224_v50, %v1220_v17  ;;  %v496_v46 = vadd.f32 %v495_v38, %v2421_v14 }
 0x17e   : > { %v995_v27 = vsel %vm3196_vm10, %v3107_v22, %v991_v29  ;;  %v1230_v21 = vmul.f32 %v3152_v7, %v1229_v30  ;;  %v1380_v16 = vadd.f32 %v1348_v42, %v644_v18  ;;  %vm997_vm11 = vcmp.eq.f32.partialorder %v996_v8, 8.507059e+37  ;;  %v3245_v30 = vld [vmem:[%s2388_s30 + $0x38] sm:$0xff]  }
 0x17f   : > { %v999_v40 = vor.u32 1.1754944e-38, %v998_v41  ;;  %v1317_v20 = vunpack.c.h.bf16 %v3146_v58  ;;  %vm1232_vm12 = vweird.f32 %v3119_v37  ;;  %vm1233_vm13 = vweird.f32 %v3152_v7  ;;  %v254_v41 = vld [vmem:[%s2388_s30 + $0x78] sm:$0xff]  }
 0x180   : > { %v3210_v36 = vpop.eup %2088  ;;  %v1231_v34 = vadd.f32 %v3152_v7, %v1230_v21  ;;  %v1236_v49 = vand.u32 2147483647, %v3119_v37  ;;  %v1300_v55 = vsub.f32 1.0, %v1225_v57  ;;  %vm3220_vm14 = vmor %vm1232_vm12, %vm1233_vm13  ;;  %v1238_v51 = vand.u32 2147483648, %v3119_v37 }
 0x181   : > { %v3216_v54 = vpop.eup %2090  ;;  %v1243_v22 = vmul.f32 %v3210_v36, %v3165_v15  ;;  %v1000_v25 = vsel %vm997_vm11, %v999_v40, %v995_v27  ;;  %v645_v63 = vmax.f32 %v496_v46, 0.0  ;;  %v536_v9 = vadd.f32 %v535_v53, %v2421_v14  ;;  %v500_v27 = vpop.f32.mrf.mxu0 }
 0x182   : > { %v1285_v12 = vsub.f32 1.0, %v1000_v25  ;;  %v1235_v0 = vsel %vm3220_vm14, %v3152_v7, %v1231_v34  ;;  %v1018_v47 = vmul.f32 %v3216_v54, %v3176_v45  ;;  %v1239_v19 = vor.u32 1.1754944e-38, %v1238_v51 }
 0x183   : > { %v2093_v58 = vpop.eup %2092  ;;  %v1333_v39 = vunpack.c.h.bf16 %v3179_v23  ;;  %v1005_v28 = vmul.f32 %v3156_v33, %v1004_v1  ;;  %v1244_v6 = vsub.f32 1.0, %v1243_v22  ;;  %vm1237_vm15 = vcmp.eq.f32.partialorder %v1236_v49, 8.507059e+37  ;;  %v538_v23 = vpop.f32.mrf.mxu2 }
 0x184   : > { %v3233_v60 = vadd.f32 1.0, %v2093_v58  ;;  %v1349_v37 = vmul.f32 %v1317_v20, %v1285_v12  ;;  %v1364_v62 = vmul.f32 %v1332_v31, %v1300_v55  ;;  %v1240_v35 = vsel %vm1237_vm15, %v1239_v19, %v1235_v0 }
 0x185   : > { %v1006_v7 = vadd.f32 %v3156_v33, %v1005_v28  ;;  %vm1007_vm0 = vweird.f32 %v3122_v59  ;;  %v1301_v4 = vsub.f32 1.0, %v1240_v35  ;;  %vm1008_vm1 = vweird.f32 %v3156_v33 }
 0x186   : > { %2094 = vrcp.f32 %v3233_v60  ;;  %v1381_v56 = vadd.f32 %v1349_v37, %v645_v63  ;;  %v1019_v5 = vsub.f32 1.0, %v1018_v47  ;;  %v661_v11 = vmax.f32 %v536_v9, 0.0  ;;  %vm3249_vm2 = vmor %vm1007_vm0, %vm1008_vm1 }
 0x187   : > { %v1013_v61 = vand.u32 2147483648, %v3122_v59  ;;  %v1365_v13 = vmul.f32 %v1333_v39, %v1301_v4  ;;  %v1011_v52 = vand.u32 2147483647, %v3122_v59  ;;  %v1245_v17 = vmul.f32 %v3210_v36, %v1244_v6 }
 0x188   : > { %v1817_v18 = vpack.c.bf16 %v1381_v56, %v1380_v16  ;;  %v1396_v32 = vadd.f32 %v1364_v62, %v660_v44  ;;  %vm1248_vm3 = vweird.f32 %v3210_v36  ;;  %v1010_v48 = vsel %vm3249_vm2, %v3156_v33, %v1006_v7 }
 0x189   : > { %v1397_v38 = vadd.f32 %v1365_v13, %v661_v11  ;;  %v1246_v26 = vadd.f32 %v3210_v36, %v1245_v17  ;;  %v1253_v44 = vand.u32 2147483648, %v3165_v15  ;;  %v1014_v42 = vor.u32 1.1754944e-38, %v1013_v61 }
 0x18a   : > { %1869 = vst [vmem:[%s2599_s18 + $0x30] sm:$0xff] %v1817_v18   ;;  %vm1247_vm4 = vweird.f32 %v3165_v15  ;;  %v1251_v59 = vand.u32 2147483647, %v3165_v15  ;;  %v1020_v50 = vmul.f32 %v3216_v54, %v1019_v5  ;;  %v499_v29 = vadd.f32 %v498_v2, %v2421_v14 }
 0x18b   : > { %v1857_v31 = vpack.c.bf16 %v1397_v38, %v1396_v32  ;;  %vm1012_vm5 = vcmp.eq.f32.partialorder %v1011_v52, 8.507059e+37  ;;  %v1318_v1 = vunpack.c.l.bf16 %v3245_v30  ;;  %vm3267_vm6 = vmor %vm1247_vm4, %vm1248_vm3  ;;  %v1254_v46 = vor.u32 1.1754944e-38, %v1253_v44  ;;  %v540_v63 = vpop.f32.mrf.mxu2 }
 0x18c   : > { %v2095_v24 = vpop.eup %2094  ;;  %v1015_v8 = vsel %vm1012_vm5, %v1014_v42, %v1010_v48  ;;  %v1250_v15 = vsel %vm3267_vm6, %v3210_v36, %v1246_v26  ;;  %v1021_v57 = vadd.f32 %v3216_v54, %v1020_v50  ;;  %vm1022_vm7 = vweird.f32 %v3176_v45 }
 0x18d   : > { %v1258_v43 = vmul.f32 %v2095_v24, %v3233_v60  ;;  %1877 = vst [vmem:[%s2599_s18 + $0x70] sm:$0xff] %v1857_v31   ;;  %vm1023_vm8 = vweird.f32 %v3216_v54  ;;  %v1026_v53 = vand.u32 2147483647, %v3176_v45  ;;  %v539_v16 = vadd.f32 %v538_v23, %v2421_v14 }
 0x18e   : > { %vm1252_vm9 = vcmp.eq.f32.partialorder %v1251_v59, 8.507059e+37  ;;  %vm3282_vm10 = vmor %vm1022_vm7, %vm1023_vm8  ;;  %v1028_v20 = vand.u32 2147483648, %v3176_v45  ;;  %v1286_v36 = vsub.f32 1.0, %v1015_v8  ;;  %v1334_v49 = vunpack.c.l.bf16 %v254_v41 }
 0x18f   : > { %v1259_v21 = vsub.f32 1.0, %v1258_v43  ;;  %v1255_v34 = vsel %vm1252_vm9, %v1254_v46, %v1250_v15  ;;  %v1025_v22 = vsel %vm3282_vm10, %v3216_v54, %v1021_v57  ;;  %v501_v55 = vadd.f32 %v500_v27, %v2421_v14 }
 0x190   : > { %v1029_v25 = vor.u32 1.1754944e-38, %v1028_v20  ;;  %v1319_v10 = vunpack.c.h.bf16 %v3245_v30  ;;  %vm1027_vm11 = vcmp.eq.f32.partialorder %v1026_v53, 8.507059e+37  ;;  %vm1263_vm12 = vweird.f32 %v2095_v24 }
 0x191   : > { %v1260_v51 = vmul.f32 %v2095_v24, %v1259_v21  ;;  %v1266_v12 = vand.u32 2147483647, %v3233_v60  ;;  %v1268_v45 = vand.u32 2147483648, %v3233_v60  ;;  %v1302_v9 = vsub.f32 1.0, %v1255_v34 }
 0x192   : > { %v1030_v0 = vsel %vm1027_vm11, %v1029_v25, %v1025_v22  ;;  %vm1262_vm13 = vweird.f32 %v3233_v60  ;;  %v646_v54 = vmax.f32 %v499_v29, 0.0  ;;  %v1350_v47 = vmul.f32 %v1318_v1, %v1286_v36 }
 0x193   : > { %v1261_v58 = vadd.f32 %v2095_v24, %v1260_v51  ;;  %v1287_v19 = vsub.f32 1.0, %v1030_v0  ;;  %vm1264_vm14 = vmor %vm1262_vm13, %vm1263_vm12  ;;  %v1269_v39 = vor.u32 1.1754944e-38, %v1268_v45  ;;  %v541_v28 = vadd.f32 %v540_v63, %v2421_v14 }
 0x194   : > { %vm1267_vm15 = vcmp.eq.f32.partialorder %v1266_v12, 8.507059e+37  ;;  %v1335_v37 = vunpack.c.h.bf16 %v254_v41  ;;  %v647_v2 = vmax.f32 %v501_v55, 0.0  ;;  %v662_v60 = vmax.f32 %v539_v16, 0.0 }
 0x195   : > { %v1265_v6 = vsel %vm1264_vm14, %v2095_v24, %v1261_v58  ;;  %v1351_v62 = vmul.f32 %v1319_v10, %v1287_v19  ;;  %v1366_v7 = vmul.f32 %v1334_v49, %v1302_v9  ;;  %v1382_v4 = vadd.f32 %v1350_v47, %v646_v54 }
 0x196   : > { %v1270_v35 = vsel %vm1267_vm15, %v1269_v39, %v1265_v6  ;;  %v663_v11 = vmax.f32 %v541_v28, 0.0 }
 0x197   : > { %v1303_v56 = vsub.f32 1.0, %v1270_v35  ;;  %v1383_v5 = vadd.f32 %v1351_v62, %v647_v2  ;;  %v1398_v18 = vadd.f32 %v1366_v7, %v662_v60 }
 0x199   : > { %v1367_v14 = vmul.f32 %v1335_v37, %v1303_v56  ;;  %v1822_v61 = vpack.c.bf16 %v1383_v5, %v1382_v4 }
 0x19b   : > { %v1399_v13 = vadd.f32 %v1367_v14, %v663_v11  ;;  %1870 = vst [vmem:[%s2599_s18 + $0x38] sm:$0xff] %v1822_v61  }
 0x19d   : > { %v1862_v52 = vpack.c.bf16 %v1399_v13, %v1398_v18 }
 0x19f   : > { %1878 = vst [vmem:[%s2599_s18 + $0x78] sm:$0xff] %v1862_v52  }
 0x1a0   : > { %2213 = shalt.err (!%p2210_p10)
}
 0x1a1   : > { %s2264_s22 = smov 64   ;;  %s2265_s24 = smov 4  }
 0x1a2   : > { %1905 = dma.vmem_to_hbm [thread:$0]  (%p2352_p3), %s1478_s16, 2048, %s1480_s29, %s1465_s4, %s2264_s22, %s2264_s22, %s2265_s24  }
 0x1a3 PF: > { %s1494_s25 = sand.u32 1, %s2244_s12   ;;  %p3401_p12 = scmp.ge.s32.totalorder %s2256_s15, 2 }
 0x1a4   : > { %s1495_s30 = scalar_lea.sflag [#allocation4], %s1494_s25 }
 0x1a5   : > { %p1919_p13 = pnand %p3401_p12, %p2321_p6 }
 0x1a7   : > { %p1920_p0 = pneg %p1919_p13 }
 0x1a9   : > { %2239 = dma.done.wait (%p1920_p0), %s1495_s30, 2048  }
 0x1aa   : > { %2241 = vsyncadd (%p1920_p0), %s1495_s30, 4294965248  ;;  %p17_p5 = scmp.ge.s32.totalorder %s2342_s6, 4   ;;  %s3402_s12 = smov %s2248_s13 }
 0x1ab   : > { %s3403_s13 = smov %s2252_s14  ;;  %s3404_s14 = smov %s2358_s10 }
 0x1ac   : > { %s3405_s15 = smov %s2342_s6  ;;  %19 = sbr.rel (!%p17_p5) target bundleno = 6 (0x6), region = 85 }
 0x1b1   :  { %1501 = vsyncpa [#allocation3], 1 }
 0x1b2   :  { %1503 = vsyncpa [#allocation3 + $0x1], 1 }
 0x1b3   :  { %1504 = vsyncpa [#allocation6], 1 }
 0x1b4   :  { %1505 = vsyncpa [#allocation4], 1 }
 0x1b5   :  { %1507 = vsyncpa [#allocation4 + $0x1], 1 }

</bundles_post_ra>
